<compile_context>
chip_gen: v5e
topology: v5e:2x2
jax: 0.10.0
libtpu: 0.0.40
codegen_flags: <defaults>
</compile_context>

<pallas_src>
import jax
import jax.numpy as jnp
from jax.experimental import pallas as pl
from jax.experimental.pallas import tpu as pltpu

LANE = 128


def _round_up(x, m):
    return (x + m - 1) // m * m


# ----------------------------------------------------------------------------- #
# Fused kernel: relu -> (pool⊗conv1) matmul -> BN1+relu -> conv2 matmul ->
# BN2+relu -> classifier matmul.  Everything is a clean MXU pass on lane-dense
# operands; elementwise math stays f32 on the VPU.
# ----------------------------------------------------------------------------- #
def aux_head_kernel(x_ref, wpc_ref, s1_ref, b1_ref, w2_ref, s2_ref, b2_ref,
                    wl_ref, bl_ref, o_ref):
    # (TN, 64*C) f32 lane-dense activation slab.
    x = jnp.maximum(x_ref[...], 0.0)                     # ReLU (f32, full-width VPU)
    xb = x.astype(jnp.bfloat16)

    # AvgPool2d(5,3) on 8x8 + Conv2d(C,128,1) fused: one (TN,64C)@(64C,512) matmul.
    z = jnp.dot(xb, wpc_ref[...], preferred_element_type=jnp.float32)
    z = jnp.maximum(z * s1_ref[...] + b1_ref[...], 0.0)  # folded BN1 + ReLU (TN,512)

    # Conv2d(128,768,2) over the 2x2 pooled map: all 4 taps as one K=512 matmul.
    y = jnp.dot(z.astype(jnp.bfloat16), w2_ref[...],
                preferred_element_type=jnp.float32)
    y = jnp.maximum(y * s2_ref[...] + b2_ref[...], 0.0)  # folded BN2 + ReLU (TN,768)

    # Linear classifier; output padded to a multiple of 128 lanes -> unmasked vst.
    out = jnp.dot(y.astype(jnp.bfloat16), wl_ref[...],
                  preferred_element_type=jnp.float32) + bl_ref[...]
    o_ref[...] = out.astype(o_ref.dtype)


# ----------------------------------------------------------------------------- #
# Wrapper-side parameter fusion / padding / casting.
# ----------------------------------------------------------------------------- #
def prep_params(params):
    w1 = params["w1"]                                    # (C, 128)
    c = w1.shape[0]

    # Fused pool ⊗ conv1 weight: (64*C, 4*128).  Column block k = 2*h + w holds
    # w1 / 25 at rows belonging to that 5x5 window (offsets {0,3}), zeros elsewhere.
    blocks = []
    for h in range(2):
        for w in range(2):
            m = jnp.zeros((8, 8), jnp.float32)
            m = m.at[3 * h:3 * h + 5, 3 * w:3 * w + 5].set(1.0 / 25.0)
            blk = (m.reshape(64, 1, 1) * w1.reshape(1, c, 128)).reshape(64 * c, 128)
            blocks.append(blk)
    wpc = jnp.concatenate(blocks, axis=1)                # (64*C, 512)

    s1 = jnp.tile(params["s1"], (1, 4))                  # (1, 512) -- per pooled pos
    b1 = jnp.tile(params["b1"], (1, 4))

    # (2,2,128,768) -> (512,768); row block k = 2*h + w matches the z_cat order.
    w2 = params["w2"].reshape(4 * 128, 768)

    wl, bl = params["wl"], params["bl"]                  # (768, nc), (1, nc)
    nc = wl.shape[1]
    nc_pad = max(LANE, _round_up(nc, LANE))
    wl_pad = jnp.zeros((768, nc_pad), jnp.float32).at[:, :nc].set(wl)
    bl_pad = jnp.zeros((1, nc_pad), jnp.float32).at[:, :nc].set(bl)

    return {
        "wpc": wpc.astype(jnp.bfloat16),
        "s1": s1, "b1": b1,
        "w2": w2.astype(jnp.bfloat16),
        "s2": params["s2"], "b2": params["b2"],
        "wl": wl_pad.astype(jnp.bfloat16),
        "bl": bl_pad,
        "nc": nc, "nc_pad": nc_pad,
    }


def auxiliary_head_cifar(x_nchw, prepped):
    """NCHW input -> lane-dense (N, 64*C) slab -> single fused pallas_call."""
    n, c, hh, ww = x_nchw.shape
    assert (hh, ww) == (8, 8), "AuxiliaryHeadCIFAR assumes 8x8 spatial input"
    k = 64 * c
    nc_pad = prepped["nc_pad"]

    x2d = jnp.transpose(x_nchw, (0, 2, 3, 1)).reshape(n, k).astype(jnp.float32)

    # Batch tiling: lets BlockSpec double-buffer the activation DMA and shards
    # the grid across TensorCores ("parallel").  TN multiple of 8 (f32 sublanes).
    tn = 256 if n >= 256 else _round_up(n, 8)
    n_pad = _round_up(n, tn)
    if n_pad != n:
        x2d = jnp.pad(x2d, ((0, n_pad - n), (0, 0)))

    # VMEM budget: bf16 weights (~1.2 MiB resident) + 2x double-buffered
    # (TN, 64C) f32 / (TN, nc_pad) f32 tiles -- well under the 32 MiB scoped
    # default on every generation (incl. v7x's 64 MiB physical VMEM).
    out = pl.pallas_call(
        aux_head_kernel,
        out_shape=jax.ShapeDtypeStruct((n_pad, nc_pad), jnp.float32),
        grid=(n_pad // tn,),
        in_specs=[
            pl.BlockSpec((tn, k), lambda i: (i, 0)),          # x (batch-tiled)
            pl.BlockSpec((k, 512), lambda i: (0, 0)),         # fused pool⊗conv1
            pl.BlockSpec((1, 512), lambda i: (0, 0)),         # s1 (tiled x4)
            pl.BlockSpec((1, 512), lambda i: (0, 0)),         # b1 (tiled x4)
            pl.BlockSpec((512, 768), lambda i: (0, 0)),       # conv2, taps fused
            pl.BlockSpec((1, 768), lambda i: (0, 0)),         # s2
            pl.BlockSpec((1, 768), lambda i: (0, 0)),         # b2
            pl.BlockSpec((768, nc_pad), lambda i: (0, 0)),    # classifier W (padded)
            pl.BlockSpec((1, nc_pad), lambda i: (0, 0)),      # classifier b (padded)
        ],
        out_specs=pl.BlockSpec((tn, nc_pad), lambda i: (i, 0)),
        compiler_params=pltpu.CompilerParams(
            dimension_semantics=("parallel",)),
    )(x2d, prepped["wpc"], prepped["s1"], prepped["b1"], prepped["w2"],
      prepped["s2"], prepped["b2"], prepped["wl"], prepped["bl"])

    return out[:n, :prepped["nc"]]


# ----------------------------------------------------------------------------- #
# Deterministic synthetic parameters and a pure-JAX f32 reference.
# ----------------------------------------------------------------------------- #
def make_params(key, c_in, num_classes):
    ks = jax.random.split(key, 12)
    eps = 1e-5

    w1 = jax.random.normal(ks[0], (c_in, 128), jnp.float32) * 0.1
    w2 = jax.random.normal(ks[1], (2, 2, 128, 768), jnp.float32) * 0.05
    wl = jax.random.normal(ks[2], (768, num_classes), jnp.float32) * 0.05
    bl = jax.random.normal(ks[3], (1, num_classes), jnp.float32) * 0.01

    g1 = 1.0 + 0.1 * jax.random.normal(ks[4], (128,), jnp.float32)
    be1 = 0.1 * jax.random.normal(ks[5], (128,), jnp.float32)
    m1 = 0.05 * jax.random.normal(ks[6], (128,), jnp.float32)
    v1 = 0.5 + jax.random.uniform(ks[7], (128,), jnp.float32)

    g2 = 1.0 + 0.1 * jax.random.normal(ks[8], (768,), jnp.float32)
    be2 = 0.1 * jax.random.normal(ks[9], (768,), jnp.float32)
    m2 = 0.05 * jax.random.normal(ks[10], (768,), jnp.float32)
    v2 = 0.5 + jax.random.uniform(ks[11], (768,), jnp.float32)

    s1 = g1 / jnp.sqrt(v1 + eps)
    b1 = be1 - m1 * s1
    s2 = g2 / jnp.sqrt(v2 + eps)
    b2 = be2 - m2 * s2

    return {
        "w1": w1, "s1": s1.reshape(1, 128), "b1": b1.reshape(1, 128),
        "w2": w2, "s2": s2.reshape(1, 768), "b2": b2.reshape(1, 768),
        "wl": wl, "bl": bl,
    }


def reference(x_nchw, p):
    """Pure-JAX f32 reference with the original (unfused) math."""
    x = jnp.maximum(x_nchw.astype(jnp.float32), 0.0)
    acc = 0.0
    for h in range(2):
        for w in range(2):
            pool = jnp.mean(x[:, :, 3 * h:3 * h + 5, 3 * w:3 * w + 5], axis=(2, 3))
            z = jnp.maximum(pool @ p["w1"] * p["s1"] + p["b1"], 0.0)
            acc = acc + z @ p["w2"][h, w]
    y = jnp.maximum(acc * p["s2"] + p["b2"], 0.0)
    return y @ p["wl"] + p["bl"]


if __name__ == "__main__":
    key = jax.random.PRNGKey(0)
    k_x, k_p = jax.random.split(key)

    N, C, H, W = 2, 4, 8, 8            # module assumes 8x8 spatial input
    num_classes = 10

    x = jax.random.normal(k_x, (N, C, H, W), jnp.float32)   # NCHW like PyTorch
    params = make_params(k_p, C, num_classes)
    prepped = prep_params(params)

    out = auxiliary_head_cifar(x, prepped)
    out = jax.block_until_ready(out)

    ref = reference(x, params)
    assert out.shape == (N, num_classes)
    # bf16 MXU operands (f32 accumulation) => looser tolerance than pure f32.
    assert jnp.allclose(out, ref, rtol=5e-2, atol=5e-2)

    print("KERNEL_OK")
</pallas_src>

<mosaic_0001>
module attributes {stable_mosaic.version = 11 : i64} {
  func.func @aux_head_kernel(%arg0: i32, %arg1: memref<8x256xf32, #tpu.memory_space<vmem>>, %arg2: memref<256x512xbf16, #tpu.memory_space<vmem>>, %arg3: memref<1x512xf32, #tpu.memory_space<vmem>>, %arg4: memref<1x512xf32, #tpu.memory_space<vmem>>, %arg5: memref<512x768xbf16, #tpu.memory_space<vmem>>, %arg6: memref<1x768xf32, #tpu.memory_space<vmem>>, %arg7: memref<1x768xf32, #tpu.memory_space<vmem>>, %arg8: memref<768x128xbf16, #tpu.memory_space<vmem>>, %arg9: memref<1x128xf32, #tpu.memory_space<vmem>>, %arg10: memref<8x128xf32, #tpu.memory_space<vmem>>) attributes {dimension_semantics = [#tpu.dimension_semantics<parallel>], iteration_bounds = array<i64: 1>, scalar_prefetch = 0 : i64, scratch_operands = 0 : i64, tpu.core_type = #tpu.core_type<tc>, window_params = [{transform_indices = @transform_0, window_bounds = array<i64: 8, 256>}, {pipeline_mode = #tpu.pipeline_mode<synchronous>, transform_indices = @transform_1, window_bounds = array<i64: 256, 512>}, {pipeline_mode = #tpu.pipeline_mode<synchronous>, transform_indices = @transform_2, window_bounds = array<i64: 1, 512>}, {pipeline_mode = #tpu.pipeline_mode<synchronous>, transform_indices = @transform_3, window_bounds = array<i64: 1, 512>}, {pipeline_mode = #tpu.pipeline_mode<synchronous>, transform_indices = @transform_4, window_bounds = array<i64: 512, 768>}, {pipeline_mode = #tpu.pipeline_mode<synchronous>, transform_indices = @transform_5, window_bounds = array<i64: 1, 768>}, {pipeline_mode = #tpu.pipeline_mode<synchronous>, transform_indices = @transform_6, window_bounds = array<i64: 1, 768>}, {pipeline_mode = #tpu.pipeline_mode<synchronous>, transform_indices = @transform_7, window_bounds = array<i64: 768, 128>}, {pipeline_mode = #tpu.pipeline_mode<synchronous>, transform_indices = @transform_8, window_bounds = array<i64: 1, 128>}, {transform_indices = @transform_9, window_bounds = array<i64: 8, 128>}]} {
    %c0 = arith.constant 0 : index
    %c0_0 = arith.constant 0 : index
    %0 = vector.load %arg1[%c0, %c0_0] : memref<8x256xf32, #tpu.memory_space<vmem>>, vector<8x256xf32>
    %cst = arith.constant 0.000000e+00 : f32
    %1 = vector.broadcast %cst : f32 to vector<8x256xf32>
    %2 = arith.maximumf %0, %1 : vector<8x256xf32>
    %3 = arith.truncf %2 : vector<8x256xf32> to vector<8x256xbf16>
    %c0_1 = arith.constant 0 : index
    %c0_2 = arith.constant 0 : index
    %4 = vector.load %arg2[%c0_1, %c0_2] : memref<256x512xbf16, #tpu.memory_space<vmem>>, vector<256x512xbf16>
    %cst_3 = arith.constant dense<0.000000e+00> : vector<8x512xf32>
    %5 = tpu.matmul %3, %4, %cst_3 {dimension_numbers = #tpu.dot_dimension_numbers<[1], [0], [0], [1], [0, 0, 1, 1], [], []>} : vector<8x256xbf16>, vector<256x512xbf16>, vector<8x512xf32> -> vector<8x512xf32>
    %c0_4 = arith.constant 0 : index
    %c0_5 = arith.constant 0 : index
    %6 = vector.load %arg3[%c0_4, %c0_5] : memref<1x512xf32, #tpu.memory_space<vmem>>, vector<1x512xf32>
    %7 = vector.broadcast %6 : vector<1x512xf32> to vector<8x512xf32>
    %8 = arith.mulf %5, %7 : vector<8x512xf32>
    %c0_6 = arith.constant 0 : index
    %c0_7 = arith.constant 0 : index
    %9 = vector.load %arg4[%c0_6, %c0_7] : memref<1x512xf32, #tpu.memory_space<vmem>>, vector<1x512xf32>
    %10 = vector.broadcast %9 : vector<1x512xf32> to vector<8x512xf32>
    %11 = arith.addf %8, %10 : vector<8x512xf32>
    %cst_8 = arith.constant 0.000000e+00 : f32
    %12 = vector.broadcast %cst_8 : f32 to vector<8x512xf32>
    %13 = arith.maximumf %11, %12 : vector<8x512xf32>
    %14 = arith.truncf %13 : vector<8x512xf32> to vector<8x512xbf16>
    %c0_9 = arith.constant 0 : index
    %c0_10 = arith.constant 0 : index
    %15 = vector.load %arg5[%c0_9, %c0_10] : memref<512x768xbf16, #tpu.memory_space<vmem>>, vector<512x768xbf16>
    %cst_11 = arith.constant dense<0.000000e+00> : vector<8x768xf32>
    %16 = tpu.matmul %14, %15, %cst_11 {dimension_numbers = #tpu.dot_dimension_numbers<[1], [0], [0], [1], [0, 0, 1, 1], [], []>} : vector<8x512xbf16>, vector<512x768xbf16>, vector<8x768xf32> -> vector<8x768xf32>
    %c0_12 = arith.constant 0 : index
    %c0_13 = arith.constant 0 : index
    %17 = vector.load %arg6[%c0_12, %c0_13] : memref<1x768xf32, #tpu.memory_space<vmem>>, vector<1x768xf32>
    %18 = vector.broadcast %17 : vector<1x768xf32> to vector<8x768xf32>
    %19 = arith.mulf %16, %18 : vector<8x768xf32>
    %c0_14 = arith.constant 0 : index
    %c0_15 = arith.constant 0 : index
    %20 = vector.load %arg7[%c0_14, %c0_15] : memref<1x768xf32, #tpu.memory_space<vmem>>, vector<1x768xf32>
    %21 = vector.broadcast %20 : vector<1x768xf32> to vector<8x768xf32>
    %22 = arith.addf %19, %21 : vector<8x768xf32>
    %cst_16 = arith.constant 0.000000e+00 : f32
    %23 = vector.broadcast %cst_16 : f32 to vector<8x768xf32>
    %24 = arith.maximumf %22, %23 : vector<8x768xf32>
    %25 = arith.truncf %24 : vector<8x768xf32> to vector<8x768xbf16>
    %c0_17 = arith.constant 0 : index
    %c0_18 = arith.constant 0 : index
    %26 = vector.load %arg8[%c0_17, %c0_18] : memref<768x128xbf16, #tpu.memory_space<vmem>>, vector<768x128xbf16>
    %cst_19 = arith.constant dense<0.000000e+00> : vector<8x128xf32>
    %27 = tpu.matmul %25, %26, %cst_19 {dimension_numbers = #tpu.dot_dimension_numbers<[1], [0], [0], [1], [0, 0, 1, 1], [], []>} : vector<8x768xbf16>, vector<768x128xbf16>, vector<8x128xf32> -> vector<8x128xf32>
    %c0_20 = arith.constant 0 : index
    %c0_21 = arith.constant 0 : index
    %28 = vector.load %arg9[%c0_20, %c0_21] : memref<1x128xf32, #tpu.memory_space<vmem>>, vector<1x128xf32>
    %29 = vector.broadcast %28 : vector<1x128xf32> to vector<8x128xf32>
    %30 = arith.addf %27, %29 : vector<8x128xf32>
    %c0_22 = arith.constant 0 : index
    %c0_23 = arith.constant 0 : index
    %31 = vector.load %arg10[%c0_22, %c0_23] : memref<8x128xf32, #tpu.memory_space<vmem>>, vector<8x128xf32>
    tpu.vector_store %arg10[%c0_22, %c0_23], %30 {strides = array<i32>} : memref<8x128xf32, #tpu.memory_space<vmem>>, vector<8x128xf32>,
    return
  }
  func.func @transform_0(%arg0: i32) -> (i32, i32) {
    %c0_i32 = arith.constant 0 : i32
    %c0_i32_0 = arith.constant 0 : i32
    return %arg0, %c0_i32 : i32, i32
  }
  func.func @transform_1(%arg0: i32) -> (i32, i32) {
    %c0_i32 = arith.constant 0 : i32
    %c0_i32_0 = arith.constant 0 : i32
    %c0_i32_1 = arith.constant 0 : i32
    return %c0_i32, %c0_i32_0 : i32, i32
  }
  func.func @transform_2(%arg0: i32) -> (i32, i32) {
    %c0_i32 = arith.constant 0 : i32
    %c0_i32_0 = arith.constant 0 : i32
    %c0_i32_1 = arith.constant 0 : i32
    return %c0_i32, %c0_i32_0 : i32, i32
  }
  func.func @transform_3(%arg0: i32) -> (i32, i32) {
    %c0_i32 = arith.constant 0 : i32
    %c0_i32_0 = arith.constant 0 : i32
    %c0_i32_1 = arith.constant 0 : i32
    return %c0_i32, %c0_i32_0 : i32, i32
  }
  func.func @transform_4(%arg0: i32) -> (i32, i32) {
    %c0_i32 = arith.constant 0 : i32
    %c0_i32_0 = arith.constant 0 : i32
    %c0_i32_1 = arith.constant 0 : i32
    return %c0_i32, %c0_i32_0 : i32, i32
  }
  func.func @transform_5(%arg0: i32) -> (i32, i32) {
    %c0_i32 = arith.constant 0 : i32
    %c0_i32_0 = arith.constant 0 : i32
    %c0_i32_1 = arith.constant 0 : i32
    return %c0_i32, %c0_i32_0 : i32, i32
  }
  func.func @transform_6(%arg0: i32) -> (i32, i32) {
    %c0_i32 = arith.constant 0 : i32
    %c0_i32_0 = arith.constant 0 : i32
    %c0_i32_1 = arith.constant 0 : i32
    return %c0_i32, %c0_i32_0 : i32, i32
  }
  func.func @transform_7(%arg0: i32) -> (i32, i32) {
    %c0_i32 = arith.constant 0 : i32
    %c0_i32_0 = arith.constant 0 : i32
    %c0_i32_1 = arith.constant 0 : i32
    return %c0_i32, %c0_i32_0 : i32, i32
  }
  func.func @transform_8(%arg0: i32) -> (i32, i32) {
    %c0_i32 = arith.constant 0 : i32
    %c0_i32_0 = arith.constant 0 : i32
    %c0_i32_1 = arith.constant 0 : i32
    return %c0_i32, %c0_i32_0 : i32, i32
  }
  func.func @transform_9(%arg0: i32) -> (i32, i32) {
    %c0_i32 = arith.constant 0 : i32
    %c0_i32_0 = arith.constant 0 : i32
    return %arg0, %c0_i32 : i32, i32
  }
}

</mosaic_0001>

<bundles_post_ra>
// kernel: tpu_custom_call.1
= control target key start
LH: loop header
LB: loop body
LE: loop exit
PB: predicated region body
PF: predicated region fallthrough
CT: control target
= control target key end

     0   :  { %14 = vsyncpa [#allocation3], 0  ;;  %s4625_s0 = inlined_call_operand.hbm [shape: f32[8,256], index: 0, kind: input, shape index: {}]   ;;  %s4626_s1 = inlined_call_operand.hbm [shape: bf16[256,512], index: 1, kind: input, shape index: {}]   ;;  %s4627_s2 = inlined_call_operand.hbm [shape: f32[1,512], index: 2, kind: input, shape index: {}]   ;;  %s4628_s3 = inlined_call_operand.hbm [shape: f32[1,512], index: 3, kind: input, shape index: {}]   ;;  %s4629_s4 = inlined_call_operand.hbm [shape: bf16[512,768], index: 4, kind: input, shape index: {}]   ;;  %s4630_s5 = inlined_call_operand.hbm [shape: f32[1,768], index: 5, kind: input, shape index: {}]   ;;  %s4631_s6 = inlined_call_operand.hbm [shape: f32[1,768], index: 6, kind: input, shape index: {}]   ;;  %s4632_s7 = inlined_call_operand.hbm [shape: bf16[768,128], index: 7, kind: input, shape index: {}]   ;;  %s4633_s8 = inlined_call_operand.vmem [shape: f32[1,128], index: 8, kind: input, shape index: {}]   ;;  %s4634_s9 = inlined_call_operand.hbm [shape: f32[8,128], index: 9, kind: output, shape index: {}]  }
   0x1   :  { %15 = vsyncpa [#allocation6], 0 }
   0x2   :  { %16 = vsyncpa [#allocation9], 0 }
   0x3   :  { %17 = vsyncpa [#allocation12], 0 }
   0x4   :  { %18 = vsyncpa [#allocation15], 0  ;;  %s35_s11 = sshll.u32 %s4626_s1, 4  ;;  %s36_s11 = int_to_ptr.hbm [resolvable:$true] %s35_s11 }
   0x5   :  { %19 = vsyncpa [#allocation4], 0  ;;  %s4446_s12 = smov [#allocation5]   ;;  %s60_s16 = sshll.u32 %s4628_s3, 4  ;;  %s61_s16 = int_to_ptr.hbm [resolvable:$true] %s60_s16 }
   0x6   :  { %s37_s13 = sshll.u32 %s4446_s12, 4  ;;  %s4447_s17 = smov 256   ;;  %s38_s13 = int_to_ptr.vmem [resolvable:$true] %s37_s13 }
   0x7   :  { %s4448_s18 = smov 16   ;;  %s4449_s19 = smov [#allocation8]  }
   0x8   :  { %43 = dma.hbm_to_vmem [thread:$0]  %s36_s11, 8192, %s38_s13, [#allocation6], %s4447_s17, %s4447_s17, %s4448_s18  }
   0x9   :  { %s62_s20 = sshll.u32 %s4449_s19, 4  ;;  %s84_s23 = sshll.u32 %s4630_s5, 4  ;;  %s63_s20 = int_to_ptr.vmem [resolvable:$true] %s62_s20  ;;  %s85_s23 = int_to_ptr.hbm [resolvable:$true] %s84_s23 }
   0xa   :  { %65 = dma.hbm_to_vmem [thread:$0]  %s61_s16, 64, %s63_s20, [#allocation9]  }
   0xb   :  { %s25_s25 = sshll.u32 %s4625_s0, 4  ;;  %s4450_s26 = smov [#allocation11]   ;;  %s26_s25 = int_to_ptr.hbm [resolvable:$true] %s25_s25 }
   0xc   :  { %s86_s27 = sshll.u32 %s4450_s26, 4  ;;  %s4451_s3 = smov [#allocation2]   ;;  %s87_s27 = int_to_ptr.vmem [resolvable:$true] %s86_s27 }
   0xd   :  { %89 = dma.hbm_to_vmem [thread:$0]  %s85_s23, 96, %s87_s27, [#allocation12]  }
   0xe   :  { %s27_s28 = sshll.u32 %s4451_s3, 4  ;;  %s49_s10 = sshll.u32 %s4627_s2, 4  ;;  %s28_s28 = int_to_ptr.vmem [resolvable:$true] %s27_s28  ;;  %s50_s10 = int_to_ptr.hbm [resolvable:$true] %s49_s10 }
   0xf   :  { %30 = dma.hbm_to_vmem [thread:$0]  %s26_s25, 256, %s28_s28, [#allocation3]  }
  0x10   :  { %s70_s12 = sshll.u32 %s4629_s4, 4  ;;  %s4452_s13 = smov [#allocation7]   ;;  %s71_s12 = int_to_ptr.hbm [resolvable:$true] %s70_s12 }
  0x11   :  { %s51_s0 = sshll.u32 %s4452_s13, 4  ;;  %s4453_s14 = smov [#allocation10]   ;;  %s52_s0 = int_to_ptr.vmem [resolvable:$true] %s51_s0 }
  0x12   :  { %54 = dma.hbm_to_vmem [thread:$0]  %s50_s10, 64, %s52_s0, [#allocation6]  }
  0x13   :  { %s72_s15 = sshll.u32 %s4453_s14, 4  ;;  %s4454_s16 = smov 384   ;;  %s73_s15 = int_to_ptr.vmem [resolvable:$true] %s72_s15 }
  0x14   :  { %s4455_s17 = smov 24   ;;  %s95_s19 = sshll.u32 %s4631_s6, 4  ;;  %s96_s19 = int_to_ptr.hbm [resolvable:$true] %s95_s19 }
  0x15   :  { %78 = dma.hbm_to_vmem [thread:$0]  %s71_s12, 24576, %s73_s15, [#allocation9], %s4454_s16, %s4454_s16, %s4455_s17  }
  0x16   :  { %s4456_s20 = smov [#allocation13]   ;;  %s105_s23 = sshll.u32 %s4632_s7, 4  ;;  %s106_s23 = int_to_ptr.hbm [resolvable:$true] %s105_s23 }
  0x17   :  { %s97_s21 = sshll.u32 %s4456_s20, 4  ;;  %s4457_s1 = smov [#allocation14]   ;;  %s98_s21 = int_to_ptr.vmem [resolvable:$true] %s97_s21 }
  0x18   :  { %100 = dma.hbm_to_vmem [thread:$0]  %s96_s19, 96, %s98_s21, [#allocation12]  }
  0x19   :  { %s107_s24 = sshll.u32 %s4457_s1, 4  ;;  %s4458_s25 = smov 64   ;;  %s108_s24 = int_to_ptr.vmem [resolvable:$true] %s107_s24 }
  0x1a   :  { %s4459_s26 = smov 4  }
  0x1b   :  { %113 = dma.hbm_to_vmem [thread:$0]  %s106_s23, 6144, %s108_s24, [#allocation15], %s4458_s25, %s4458_s25, %s4459_s26  }
  0x1c   :  { %4434 = dma.done.wait [#allocation3], 256  }
  0x1d   :  { %4435 = vsyncadd [#allocation3], 4294967040 }
  0x1e   :  { %4436 = dma.done.wait [#allocation6], 8256  }
  0x1f   :  { %4437 = vsyncadd [#allocation6], 4294959040 }
  0x20   :  { %4438 = dma.done.wait [#allocation9], 24640  }
  0x21   :  { %4439 = vsyncadd [#allocation9], 4294942656 }
  0x22   :  { %4440 = dma.done.wait [#allocation12], 192  }
  0x23   :  { %4441 = vsyncadd [#allocation12], 4294967104 }
  0x24   :  { %4442 = dma.done.wait [#allocation15], 6144  }
  0x25   :  { %4443 = vsyncadd [#allocation15], 4294961152  ;;  %v2796_v0 = vld [vmem:[#allocation5 + $0xe0] sm:$0xf]  ;;  %v3928_v1 = vld [vmem:[#allocation5 + $0xec] sm:$0xf0] }
  0x26   :  { %v2924_v2 = vld [vmem:[#allocation5 + $0x1e0] sm:$0xf]  ;;  %v2797_v3 = vor.u32 %v3928_v1, %v2796_v0  ;;  %v3960_v4 = vld [vmem:[#allocation5 + $0x1ec] sm:$0xf0]  ;;  %v3926_v5 = vld [vmem:[#allocation5 + $0xe4] sm:$0xf] }
  0x27   :  { %v2798_v6 = vld [vmem:[#allocation5 + $0xf0] sm:$0xf0]  ;;  %v2925_v7 = vor.u32 %v3960_v4, %v2924_v2  ;;  %v3958_v9 = vld [vmem:[#allocation5 + $0x1e4] sm:$0xf]  ;;  %v2780_v11 = vld [vmem:[#allocation5 + $0xc0] sm:$0xf] }
  0x28   :  { %v2801_v8 = vor.u32 %v3926_v5, %v2798_v6  ;;  %v2926_v10 = vld [vmem:[#allocation5 + $0x1f0] sm:$0xf0]  ;;  %538 = vmatpush.bf16.msra.mxu0 %v2797_v3  ;;  %v3924_v13 = vld [vmem:[#allocation5 + $0xcc] sm:$0xf0]  ;;  %v2908_v14 = vld [vmem:[#allocation5 + $0x1c0] sm:$0xf] }
  0x29   :  { %v2929_v12 = vor.u32 %v3958_v9, %v2926_v10  ;;  %v3956_v15 = vld [vmem:[#allocation5 + $0x1cc] sm:$0xf0]  ;;  %551 = vmatpush.bf16.msra.mxu1 %v2925_v7  ;;  %v2781_v16 = vor.u32 %v3924_v13, %v2780_v11  ;;  %v3922_v18 = vld [vmem:[#allocation5 + $0xc4] sm:$0xf]  ;;  %v2782_v19 = vld [vmem:[#allocation5 + $0xd0] sm:$0xf0] }
  0x2a   :  { %564 = vmatpush.bf16.msra.mxu2 %v2801_v8  ;;  %v2909_v17 = vor.u32 %v3956_v15, %v2908_v14  ;;  %v3954_v20 = vld [vmem:[#allocation5 + $0x1c4] sm:$0xf]  ;;  %v2785_v21 = vor.u32 %v3922_v18, %v2782_v19  ;;  %v2910_v22 = vld [vmem:[#allocation5 + $0x1d0] sm:$0xf0]  ;;  %v2764_v23 = vld [vmem:[#allocation5 + $0xa0] sm:$0xf] }
  0x2b   :  { %577 = vmatpush.bf16.msra.mxu3 %v2929_v12  ;;  %v3920_v24 = vld [vmem:[#allocation5 + $0xac] sm:$0xf0]  ;;  %v2913_v25 = vor.u32 %v3954_v20, %v2910_v22  ;;  %v2892_v26 = vld [vmem:[#allocation5 + $0x1a0] sm:$0xf]  ;;  %v3918_v28 = vld [vmem:[#allocation5 + $0xa4] sm:$0xf] }
  0x2c   :  { %v3952_v27 = vld [vmem:[#allocation5 + $0x1ac] sm:$0xf0]  ;;  %539 = vmatpush.bf16.msra.mxu0 %v2781_v16  ;;  %v2765_v29 = vor.u32 %v3920_v24, %v2764_v23  ;;  %v2766_v30 = vld [vmem:[#allocation5 + $0xb0] sm:$0xf0]  ;;  %v3950_v31 = vld [vmem:[#allocation5 + $0x1a4] sm:$0xf] }
  0x2d   :  { %v2894_v32 = vld [vmem:[#allocation5 + $0x1b0] sm:$0xf0]  ;;  %552 = vmatpush.bf16.msra.mxu1 %v2909_v17  ;;  %v2893_v33 = vor.u32 %v3952_v27, %v2892_v26  ;;  %v2769_v34 = vor.u32 %v3918_v28, %v2766_v30  ;;  %v2748_v35 = vld [vmem:[#allocation5 + $0x80] sm:$0xf]  ;;  %v3916_v36 = vld [vmem:[#allocation5 + $0x8c] sm:$0xf0] }
  0x2e   :  { %565 = vmatpush.bf16.msra.mxu2 %v2785_v21  ;;  %v2876_v37 = vld [vmem:[#allocation5 + $0x180] sm:$0xf]  ;;  %v2897_v38 = vor.u32 %v3950_v31, %v2894_v32  ;;  %v3948_v39 = vld [vmem:[#allocation5 + $0x18c] sm:$0xf0]  ;;  %v3914_v40 = vld [vmem:[#allocation5 + $0x84] sm:$0xf]  ;;  %v2749_v44 = vor.u32 %v3916_v36, %v2748_v35 }
  0x2f   :  { %578 = vmatpush.bf16.msra.mxu3 %v2913_v25  ;;  %v2750_v41 = vld [vmem:[#allocation5 + $0x90] sm:$0xf0]  ;;  %v3946_v42 = vld [vmem:[#allocation5 + $0x184] sm:$0xf]  ;;  %v2877_v45 = vor.u32 %v3948_v39, %v2876_v37  ;;  %v2732_v47 = vld [vmem:[#allocation5 + $0x60] sm:$0xf] }
  0x30   :  { %v2878_v43 = vld [vmem:[#allocation5 + $0x190] sm:$0xf0]  ;;  %540 = vmatpush.bf16.msra.mxu0 %v2765_v29  ;;  %v2753_v46 = vor.u32 %v3914_v40, %v2750_v41  ;;  %v3912_v48 = vld [vmem:[#allocation5 + $0x6c] sm:$0xf0]  ;;  %v2860_v49 = vld [vmem:[#allocation5 + $0x160] sm:$0xf] }
  0x31   :  { %553 = vmatpush.bf16.msra.mxu1 %v2893_v33  ;;  %v2881_v50 = vor.u32 %v3946_v42, %v2878_v43  ;;  %v3944_v51 = vld [vmem:[#allocation5 + $0x16c] sm:$0xf0]  ;;  %v3910_v52 = vld [vmem:[#allocation5 + $0x64] sm:$0xf]  ;;  %v2734_v53 = vld [vmem:[#allocation5 + $0x70] sm:$0xf0]  ;;  %v2733_v56 = vor.u32 %v3912_v48, %v2732_v47 }
  0x32   :  { %566 = vmatpush.bf16.msra.mxu2 %v2769_v34  ;;  %v3942_v54 = vld [vmem:[#allocation5 + $0x164] sm:$0xf]  ;;  %v2862_v55 = vld [vmem:[#allocation5 + $0x170] sm:$0xf0]  ;;  %v2861_v57 = vor.u32 %v3944_v51, %v2860_v49  ;;  %v2737_v58 = vor.u32 %v3910_v52, %v2734_v53  ;;  %v2716_v59 = vld [vmem:[#allocation5 + $0x40] sm:$0xf] }
  0x33   :  { %579 = vmatpush.bf16.msra.mxu3 %v2897_v38  ;;  %v3908_v60 = vld [vmem:[#allocation5 + $0x4c] sm:$0xf0]  ;;  %v2844_v61 = vld [vmem:[#allocation5 + $0x140] sm:$0xf]  ;;  %v2865_v62 = vor.u32 %v3942_v54, %v2862_v55  ;;  %v3906_v0 = vld [vmem:[#allocation5 + $0x44] sm:$0xf] }
  0x34   :  { %541 = vmatpush.bf16.msra.mxu0 %v2749_v44  ;;  %v3940_v63 = vld [vmem:[#allocation5 + $0x14c] sm:$0xf0]  ;;  %v2718_v1 = vld [vmem:[#allocation5 + $0x50] sm:$0xf0]  ;;  %v3938_v2 = vld [vmem:[#allocation5 + $0x144] sm:$0xf]  ;;  %v2717_v4 = vor.u32 %v3908_v60, %v2716_v59 }
  0x35   :  { %554 = vmatpush.bf16.msra.mxu1 %v2877_v45  ;;  %v2846_v3 = vld [vmem:[#allocation5 + $0x150] sm:$0xf0]  ;;  %v2700_v5 = vld [vmem:[#allocation5 + $0x20] sm:$0xf]  ;;  %v2845_v6 = vor.u32 %v3940_v63, %v2844_v61  ;;  %v2721_v7 = vor.u32 %v3906_v0, %v2718_v1  ;;  %v3904_v8 = vld [vmem:[#allocation5 + $0x2c] sm:$0xf0] }
  0x36   :  { %567 = vmatpush.bf16.msra.mxu2 %v2753_v46  ;;  %v2828_v9 = vld [vmem:[#allocation5 + $0x120] sm:$0xf]  ;;  %v3936_v10 = vld [vmem:[#allocation5 + $0x12c] sm:$0xf0]  ;;  %v2849_v11 = vor.u32 %v3938_v2, %v2846_v3  ;;  %v3902_v12 = vld [vmem:[#allocation5 + $0x24] sm:$0xf]  ;;  %v2701_v18 = vor.u32 %v3904_v8, %v2700_v5 }
  0x37   :  { %580 = vmatpush.bf16.msra.mxu3 %v2881_v50  ;;  %v2702_v13 = vld [vmem:[#allocation5 + $0x30] sm:$0xf0]  ;;  %v3934_v14 = vld [vmem:[#allocation5 + $0x124] sm:$0xf]  ;;  %v2684_v16 = vld [vmem:[#allocation5] sm:$0xf]  ;;  %v2829_v22 = vor.u32 %v3936_v10, %v2828_v9 }
  0x38   :  { %542 = vmatpush.bf16.msra.mxu0 %v2733_v56  ;;  %v2830_v15 = vld [vmem:[#allocation5 + $0x130] sm:$0xf0]  ;;  %v3900_v17 = vld [vmem:[#allocation5 + $0xc] sm:$0xf0]  ;;  %v2812_v19 = vld [vmem:[#allocation5 + $0x100] sm:$0xf]  ;;  %v2705_v23 = vor.u32 %v3902_v12, %v2702_v13 }
  0x39   :  { %555 = vmatpush.bf16.msra.mxu1 %v2861_v57  ;;  %v3932_v20 = vld [vmem:[#allocation5 + $0x10c] sm:$0xf0]  ;;  %v3898_v21 = vld [vmem:[#allocation5 + $0x4] sm:$0xf]  ;;  %v2686_v24 = vld [vmem:[#allocation5 + $0x10] sm:$0xf0]  ;;  %v2833_v27 = vor.u32 %v3934_v14, %v2830_v15  ;;  %v2685_v34 = vor.u32 %v3900_v17, %v2684_v16 }
  0x3a   :  { %568 = vmatpush.bf16.msra.mxu2 %v2737_v58  ;;  %v3930_v25 = vld [vmem:[#allocation5 + $0x104] sm:$0xf]  ;;  %v148_v26 = vld [vmem:[#allocation2] sm:$0xff]  ;;  %v2804_v29 = vld [vmem:[#allocation5 + $0xe8] sm:$0xf]  ;;  %v2813_v38 = vor.u32 %v3932_v20, %v2812_v19  ;;  %v2689_v39 = vor.u32 %v3898_v21, %v2686_v24  ;;  %s4460_s27 = smov [#allocation16]  }
  0x3b   :  { %581 = vmatpush.bf16.msra.mxu3 %v2865_v62  ;;  %v2814_v28 = vld [vmem:[#allocation5 + $0x110] sm:$0xf0]  ;;  %v149_v30 = vld [vmem:[#allocation2 + $0x8] sm:$0xff]  ;;  %v2932_v32 = vld [vmem:[#allocation5 + $0x1e8] sm:$0xf]  ;;  %v150_v37 = vmax.f32 %v148_v26, 0.0 }
  0x3c   :  { %543 = vmatpush.bf16.msra.mxu0 %v2717_v4  ;;  %v3929_v31 = vld [vmem:[#allocation5 + $0xf4] sm:$0xf0]  ;;  %v3927_v35 = vld [vmem:[#allocation5 + $0xec] sm:$0xf]  ;;  %v2806_v36 = vld [vmem:[#allocation5 + $0xf8] sm:$0xf0]  ;;  %v2817_v43 = vor.u32 %v3930_v25, %v2814_v28 }
  0x3d   :  { %556 = vmatpush.bf16.msra.mxu1 %v2845_v6  ;;  %v3961_v33 = vld [vmem:[#allocation5 + $0x1f4] sm:$0xf0]  ;;  %v3959_v40 = vld [vmem:[#allocation5 + $0x1ec] sm:$0xf]  ;;  %v2934_v41 = vld [vmem:[#allocation5 + $0x1f8] sm:$0xf0]  ;;  %v2805_v44 = vor.u32 %v3929_v31, %v2804_v29  ;;  %v2809_v46 = vor.u32 %v3927_v35, %v2806_v36  ;;  %v4535_v51 = vpack.c.bf16 %v150_v37, %v150_v37 }
  0x3e   :  { %569 = vmatpush.bf16.msra.mxu2 %v2721_v7  ;;  %v151_v42 = vmax.f32 %v149_v30, 0.0  ;;  %v2933_v45 = vor.u32 %v3961_v33, %v2932_v32  ;;  %v2788_v47 = vld [vmem:[#allocation5 + $0xc8] sm:$0xf]  ;;  %v3925_v48 = vld [vmem:[#allocation5 + $0xd4] sm:$0xf0]  ;;  %v2937_v50 = vor.u32 %v3959_v40, %v2934_v41  ;;  %s2666_s3 = sshll.u32 %s4460_s27, 4  ;;  %s2667_s3 = int_to_ptr.vmem [resolvable:$true] %s2666_s3 }
  0x3f   :  { %582 = vmatpush.bf16.msra.mxu3 %v2849_v11  ;;  %v2916_v49 = vld [vmem:[#allocation5 + $0x1c8] sm:$0xf]  ;;  %v3957_v52 = vld [vmem:[#allocation5 + $0x1d4] sm:$0xf0]  ;;  %v3923_v53 = vld [vmem:[#allocation5 + $0xcc] sm:$0xf]  ;;  %v2789_v58 = vor.u32 %v3925_v48, %v2788_v47 }
  0x40   :  { %544 = vmatpush.bf16.msra.mxu0 %v2701_v18  ;;  %v2790_v54 = vld [vmem:[#allocation5 + $0xd8] sm:$0xf0]  ;;  %v4537_v55 = vpack.c.bf16 %v151_v42, %v151_v42  ;;  %v3955_v56 = vld [vmem:[#allocation5 + $0x1cc] sm:$0xf]  ;;  %v2917_v59 = vor.u32 %v3957_v52, %v2916_v49  ;;  %v2772_v61 = vld [vmem:[#allocation5 + $0xa8] sm:$0xf] }
  0x41   :  { %557 = vmatpush.bf16.msra.mxu1 %v2829_v22  ;;  %v2918_v57 = vld [vmem:[#allocation5 + $0x1d8] sm:$0xf0]  ;;  %v2793_v60 = vor.u32 %v3923_v53, %v2790_v54  ;;  %v3921_v62 = vld [vmem:[#allocation5 + $0xb4] sm:$0xf0]  ;;  %v2900_v63 = vld [vmem:[#allocation5 + $0x1a8] sm:$0xf] }
  0x42   :  { %570 = vmatpush.bf16.msra.mxu2 %v2705_v23  ;;  %v2921_v0 = vor.u32 %v3955_v56, %v2918_v57  ;;  %v3953_v1 = vld [vmem:[#allocation5 + $0x1b4] sm:$0xf0]  ;;  %v3919_v2 = vld [vmem:[#allocation5 + $0xac] sm:$0xf]  ;;  %v2774_v3 = vld [vmem:[#allocation5 + $0xb8] sm:$0xf0]  ;;  %v2773_v6 = vor.u32 %v3921_v62, %v2772_v61 }
  0x43   :  { %583 = vmatpush.bf16.msra.mxu3 %v2833_v27  ;;  %v3951_v4 = vld [vmem:[#allocation5 + $0x1ac] sm:$0xf]  ;;  %v2902_v5 = vld [vmem:[#allocation5 + $0x1b8] sm:$0xf0]  ;;  %v2901_v7 = vor.u32 %v3953_v1, %v2900_v63  ;;  %v2777_v8 = vor.u32 %v3919_v2, %v2774_v3  ;;  %v2756_v9 = vld [vmem:[#allocation5 + $0x88] sm:$0xf] }
  0x44   :  { %545 = vmatpush.bf16.msra.mxu0 %v2685_v34  ;;  %v3917_v10 = vld [vmem:[#allocation5 + $0x94] sm:$0xf0]  ;;  %v2884_v11 = vld [vmem:[#allocation5 + $0x188] sm:$0xf]  ;;  %v2905_v12 = vor.u32 %v3951_v4, %v2902_v5  ;;  %v3915_v14 = vld [vmem:[#allocation5 + $0x8c] sm:$0xf] }
  0x45   :  { %558 = vmatpush.bf16.msra.mxu1 %v2813_v38  ;;  %v3949_v13 = vld [vmem:[#allocation5 + $0x194] sm:$0xf0]  ;;  %v2758_v15 = vld [vmem:[#allocation5 + $0x98] sm:$0xf0]  ;;  %v3947_v16 = vld [vmem:[#allocation5 + $0x18c] sm:$0xf]  ;;  %v2757_v18 = vor.u32 %v3917_v10, %v2756_v9 }
  0x46   :  { %571 = vmatpush.bf16.msra.mxu2 %v2689_v39  ;;  %v2886_v17 = vld [vmem:[#allocation5 + $0x198] sm:$0xf0]  ;;  %v2885_v19 = vor.u32 %v3949_v13, %v2884_v11  ;;  %v2761_v20 = vor.u32 %v3915_v14, %v2758_v15  ;;  %v2740_v21 = vld [vmem:[#allocation5 + $0x68] sm:$0xf]  ;;  %v3913_v22 = vld [vmem:[#allocation5 + $0x74] sm:$0xf0] }
  0x47   :  { %584 = vmatpush.bf16.msra.mxu3 %v2817_v43  ;;  %546 = vmatmul.bf16.vlgmr.msra.gmra.mxu0 %v4535_v51  ;;  %v2868_v23 = vld [vmem:[#allocation5 + $0x168] sm:$0xf]  ;;  %v2889_v24 = vor.u32 %v3947_v16, %v2886_v17  ;;  %v3945_v25 = vld [vmem:[#allocation5 + $0x174] sm:$0xf0]  ;;  %v3911_v26 = vld [vmem:[#allocation5 + $0x6c] sm:$0xf]  ;;  %v2741_v30 = vor.u32 %v3913_v22, %v2740_v21 }
  0x48   :  { %590 = vmatpush.bf16.msrb.mxu0 %v2805_v44  ;;  %559 = vmatmul.bf16.vlgmr.msra.gmra.mxu1 %v4537_v55  ;;  %v2742_v27 = vld [vmem:[#allocation5 + $0x78] sm:$0xf0]  ;;  %v3943_v28 = vld [vmem:[#allocation5 + $0x16c] sm:$0xf]  ;;  %v2869_v31 = vor.u32 %v3945_v25, %v2868_v23  ;;  %v2724_v33 = vld [vmem:[#allocation5 + $0x48] sm:$0xf] }
  0x49   :  { %603 = vmatpush.bf16.msrb.mxu1 %v2933_v45  ;;  %572 = vmatmul.bf16.vlgmr.msra.gmra.mxu2 %v4535_v51  ;;  %v2870_v29 = vld [vmem:[#allocation5 + $0x178] sm:$0xf0]  ;;  %v2745_v32 = vor.u32 %v3911_v26, %v2742_v27  ;;  %v3909_v34 = vld [vmem:[#allocation5 + $0x54] sm:$0xf0]  ;;  %v2852_v35 = vld [vmem:[#allocation5 + $0x148] sm:$0xf] }
  0x4a   :  { %616 = vmatpush.bf16.msrb.mxu2 %v2809_v46  ;;  %585 = vmatmul.bf16.vlgmr.msra.gmra.mxu3 %v4537_v55  ;;  %v2873_v36 = vor.u32 %v3943_v28, %v2870_v29  ;;  %v3941_v37 = vld [vmem:[#allocation5 + $0x154] sm:$0xf0]  ;;  %v3907_v38 = vld [vmem:[#allocation5 + $0x4c] sm:$0xf]  ;;  %v2726_v39 = vld [vmem:[#allocation5 + $0x58] sm:$0xf0]  ;;  %v2725_v42 = vor.u32 %v3909_v34, %v2724_v33 }
  0x4b   :  { %629 = vmatpush.bf16.msrb.mxu3 %v2937_v50  ;;  %v3939_v40 = vld [vmem:[#allocation5 + $0x14c] sm:$0xf]  ;;  %v2854_v41 = vld [vmem:[#allocation5 + $0x158] sm:$0xf0]  ;;  %v2708_v43 = vld [vmem:[#allocation5 + $0x28] sm:$0xf]  ;;  %v2853_v44 = vor.u32 %v3941_v37, %v2852_v35  ;;  %v2729_v45 = vor.u32 %v3907_v38, %v2726_v39 }
  0x4c   :  { %591 = vmatpush.bf16.msrb.mxu0 %v2789_v58  ;;  %v3905_v46 = vld [vmem:[#allocation5 + $0x34] sm:$0xf0]  ;;  %v2836_v47 = vld [vmem:[#allocation5 + $0x128] sm:$0xf]  ;;  %v2857_v48 = vor.u32 %v3939_v40, %v2854_v41  ;;  %v3903_v50 = vld [vmem:[#allocation5 + $0x2c] sm:$0xf] }
  0x4d   :  { %604 = vmatpush.bf16.msrb.mxu1 %v2917_v59  ;;  %v3937_v49 = vld [vmem:[#allocation5 + $0x134] sm:$0xf0]  ;;  %v2710_v52 = vld [vmem:[#allocation5 + $0x38] sm:$0xf0]  ;;  %v3935_v53 = vld [vmem:[#allocation5 + $0x12c] sm:$0xf]  ;;  %v2709_v56 = vor.u32 %v3905_v46, %v2708_v43 }
  0x4e   :  { %617 = vmatpush.bf16.msrb.mxu2 %v2793_v60  ;;  %v2838_v54 = vld [vmem:[#allocation5 + $0x138] sm:$0xf0]  ;;  %v2692_v57 = vld [vmem:[#allocation5 + $0x8] sm:$0xf]  ;;  %v2837_v58 = vor.u32 %v3937_v49, %v2836_v47  ;;  %v2713_v59 = vor.u32 %v3903_v50, %v2710_v52  ;;  %v3901_v60 = vld [vmem:[#allocation5 + $0x14] sm:$0xf0] }
  0x4f   :  { %630 = vmatpush.bf16.msrb.mxu3 %v2921_v0  ;;  %v2820_v61 = vld [vmem:[#allocation5 + $0x108] sm:$0xf]  ;;  %v3933_v62 = vld [vmem:[#allocation5 + $0x114] sm:$0xf0]  ;;  %v2841_v63 = vor.u32 %v3935_v53, %v2838_v54  ;;  %v3899_v0 = vld [vmem:[#allocation5 + $0xc] sm:$0xf] }
  0x50   :  { %592 = vmatpush.bf16.msrb.mxu0 %v2773_v6  ;;  %v2694_v1 = vld [vmem:[#allocation5 + $0x18] sm:$0xf0]  ;;  %v3931_v2 = vld [vmem:[#allocation5 + $0x10c] sm:$0xf]  ;;  %v3108_v4 = vld [vmem:[#allocation10 + $0x150] sm:$0xf]  ;;  %v2693_v6 = vor.u32 %v3901_v60, %v2692_v57  ;;  %v2821_v9 = vor.u32 %v3933_v62, %v2820_v61 }
  0x51   :  { %605 = vmatpush.bf16.msrb.mxu1 %v2901_v7  ;;  %v2822_v3 = vld [vmem:[#allocation5 + $0x118] sm:$0xf0]  ;;  %v4007_v5 = vld [vmem:[#allocation10 + $0x164] sm:$0xf0]  ;;  %v3300_v7 = vld [vmem:[#allocation10 + $0x2d0] sm:$0xf]  ;;  %v2697_v10 = vor.u32 %v3899_v0, %v2694_v1 }
  0x52   :  { %618 = vmatpush.bf16.msrb.mxu2 %v2777_v8  ;;  %v4055_v8 = vld [vmem:[#allocation10 + $0x2e4] sm:$0xf0]  ;;  %v2825_v11 = vor.u32 %v3931_v2, %v2822_v3  ;;  %v3492_v13 = vld [vmem:[#allocation10 + $0x450] sm:$0xf]  ;;  %v3084_v15 = vld [vmem:[#allocation10 + $0x120] sm:$0xf] }
  0x53   :  { %631 = vmatpush.bf16.msrb.mxu3 %v2905_v12  ;;  %v3109_v12 = vor.u32 %v4007_v5, %v3108_v4  ;;  %v4103_v14 = vld [vmem:[#allocation10 + $0x464] sm:$0xf0]  ;;  %v4001_v16 = vld [vmem:[#allocation10 + $0x134] sm:$0xf0]  ;;  %v3301_v17 = vor.u32 %v4055_v8, %v3300_v7  ;;  %v3468_v22 = vld [vmem:[#allocation10 + $0x420] sm:$0xf] }
  0x54   :  { %593 = vmatpush.bf16.msrb.mxu0 %v2757_v18  ;;  %v3276_v18 = vld [vmem:[#allocation10 + $0x2a0] sm:$0xf]  ;;  %v3085_v21 = vor.u32 %v4001_v16, %v3084_v15  ;;  %v4097_v23 = vld [vmem:[#allocation10 + $0x434] sm:$0xf0]  ;;  %v3995_v25 = vld [vmem:[#allocation10 + $0x104] sm:$0xf0] }
  0x55   :  { %606 = vmatpush.bf16.msrb.mxu1 %v2885_v19  ;;  %v4049_v19 = vld [vmem:[#allocation10 + $0x2b4] sm:$0xf0]  ;;  %v3684_v27 = vld [vmem:[#allocation10 + $0x5d0] sm:$0xf]  ;;  %v4043_v29 = vld [vmem:[#allocation10 + $0x284] sm:$0xf0] }
  0x56   :  { %619 = vmatpush.bf16.msrb.mxu2 %v2761_v20  ;;  %v3493_v20 = vor.u32 %v4103_v14, %v3492_v13  ;;  %v3277_v26 = vor.u32 %v4049_v19, %v3276_v18  ;;  %v3252_v28 = vld [vmem:[#allocation10 + $0x270] sm:$0xf]  ;;  %v3036_v34 = vld [vmem:[#allocation10 + $0xc0] sm:$0xf]  ;;  %v3989_v37 = vld [vmem:[#allocation10 + $0xd4] sm:$0xf0] }
  0x57   :  { %632 = vmatpush.bf16.msrb.mxu3 %v2889_v24  ;;  %v3060_v24 = vld [vmem:[#allocation10 + $0xf0] sm:$0xf]  ;;  %v3253_v38 = vor.u32 %v4043_v29, %v3252_v28  ;;  %v3660_v39 = vld [vmem:[#allocation10 + $0x5a0] sm:$0xf]  ;;  %v4145_v40 = vld [vmem:[#allocation10 + $0x5b4] sm:$0xf0] }
  0x58   :  { %594 = vmatpush.bf16.msrb.mxu0 %v2741_v30  ;;  %v4151_v30 = vld [vmem:[#allocation10 + $0x5e4] sm:$0xf0]  ;;  %v3061_v33 = vor.u32 %v3995_v25, %v3060_v24  ;;  %v3444_v35 = vld [vmem:[#allocation10 + $0x3f0] sm:$0xf]  ;;  %v4037_v41 = vld [vmem:[#allocation10 + $0x254] sm:$0xf0] }
  0x59   :  { %607 = vmatpush.bf16.msrb.mxu1 %v2869_v31  ;;  %v3469_v31 = vor.u32 %v4097_v23, %v3468_v22  ;;  %v4085_v46 = vld [vmem:[#allocation10 + $0x3d4] sm:$0xf0]  ;;  %v3983_v47 = vld [vmem:[#allocation10 + $0xa4] sm:$0xf0]  ;;  %v3636_v49 = vld [vmem:[#allocation10 + $0x570] sm:$0xf] }
  0x5a   :  { %620 = vmatpush.bf16.msrb.mxu2 %v2745_v32  ;;  %v3685_v32 = vor.u32 %v4151_v30, %v3684_v27  ;;  %v4139_v50 = vld [vmem:[#allocation10 + $0x584] sm:$0xf0]  ;;  %v3204_v52 = vld [vmem:[#allocation10 + $0x210] sm:$0xf]  ;;  %v2988_v60 = vld [vmem:[#allocation10 + $0x60] sm:$0xf] }
  0x5b   :  { %633 = vmatpush.bf16.msrb.mxu3 %v2873_v36  ;;  %v4091_v36 = vld [vmem:[#allocation10 + $0x404] sm:$0xf0]  ;;  %v3637_v54 = vor.u32 %v4139_v50, %v3636_v49  ;;  %v3977_v61 = vld [vmem:[#allocation10 + $0x74] sm:$0xf0]  ;;  %v2964_v3 = vld [vmem:[#allocation10 + $0x30] sm:$0xf] }
  0x5c   :  { %595 = vmatpush.bf16.msrb.mxu0 %v2725_v42  ;;  %v3661_v42 = vor.u32 %v4145_v40, %v3660_v39  ;;  %v3445_v43 = vor.u32 %v4091_v36, %v3444_v35  ;;  %v4031_v53 = vld [vmem:[#allocation10 + $0x224] sm:$0xf0]  ;;  %v4025_v0 = vld [vmem:[#allocation10 + $0x1f4] sm:$0xf0]  ;;  %v2989_v2 = vor.u32 %v3977_v61, %v2988_v60  ;;  %v3110_v13 = vld [vmem:[#allocation10 + $0x168] sm:$0xf0] }
  0x5d   :  { %608 = vmatpush.bf16.msrb.mxu1 %v2853_v44  ;;  %v3012_v44 = vld [vmem:[#allocation10 + $0x90] sm:$0xf]  ;;  %v3205_v62 = vor.u32 %v4031_v53, %v3204_v52  ;;  %v3971_v4 = vld [vmem:[#allocation10 + $0x44] sm:$0xf0]  ;;  %v3132_v14 = vld [vmem:[#allocation10 + $0x180] sm:$0xf] }
  0x5e   :  { %621 = vmatpush.bf16.msrb.mxu2 %v2729_v45  ;;  %v3420_v45 = vld [vmem:[#allocation10 + $0x3c0] sm:$0xf]  ;;  %v3013_v57 = vor.u32 %v3983_v47, %v3012_v44  ;;  %v4019_v7 = vld [vmem:[#allocation10 + $0x1c4] sm:$0xf0]  ;;  %v2965_v8 = vor.u32 %v3971_v4, %v2964_v3  ;;  %v4013_v15 = vld [vmem:[#allocation10 + $0x194] sm:$0xf0] }
  0x5f   :  { %634 = vmatpush.bf16.msrb.mxu3 %v2857_v48  ;;  %v4052_v16 = vld [vmem:[#allocation10 + $0x2d4] sm:$0xf]  ;;  %v3086_v22 = vld [vmem:[#allocation10 + $0x138] sm:$0xf0]  ;;  %v4046_v24 = vld [vmem:[#allocation10 + $0x2a4] sm:$0xf] }
  0x60   :  { %596 = vmatpush.bf16.msrb.mxu0 %v2709_v56  ;;  %v3421_v56 = vor.u32 %v4085_v46, %v3420_v45  ;;  %v3278_v25 = vld [vmem:[#allocation10 + $0x2b8] sm:$0xf0]  ;;  %v3992_v27 = vld [vmem:[#allocation10 + $0xf4] sm:$0xf]  ;;  %v3062_v28 = vld [vmem:[#allocation10 + $0x108] sm:$0xf0] }
  0x61   :  { %609 = vmatpush.bf16.msrb.mxu1 %v2837_v58  ;;  %v3396_v58 = vld [vmem:[#allocation10 + $0x390] sm:$0xf]  ;;  %v3281_v29 = vor.u32 %v4046_v24, %v3278_v25  ;;  %v4040_v30 = vld [vmem:[#allocation10 + $0x274] sm:$0xf]  ;;  %v3612_v40 = vld [vmem:[#allocation10 + $0x540] sm:$0xf] }
  0x62   :  { %622 = vmatpush.bf16.msrb.mxu2 %v2713_v59  ;;  %v4079_v59 = vld [vmem:[#allocation10 + $0x3a4] sm:$0xf0]  ;;  %v3372_v44 = vld [vmem:[#allocation10 + $0x360] sm:$0xf]  ;;  %v4073_v45 = vld [vmem:[#allocation10 + $0x374] sm:$0xf0] }
  0x63   :  { %635 = vmatpush.bf16.msrb.mxu3 %v2841_v63  ;;  %v3180_v63 = vld [vmem:[#allocation10 + $0x1e0] sm:$0xf]  ;;  %v3397_v1 = vor.u32 %v4079_v59, %v3396_v58  ;;  %v3974_v46 = vld [vmem:[#allocation10 + $0x64] sm:$0xf]  ;;  %v3373_v47 = vor.u32 %v4073_v45, %v3372_v44  ;;  %v3588_v50 = vld [vmem:[#allocation10 + $0x510] sm:$0xf] }
  0x64   :  { %597 = vmatpush.bf16.msrb.mxu0 %v2693_v6  ;;  %v3181_v5 = vor.u32 %v4025_v0, %v3180_v63  ;;  %v3156_v6 = vld [vmem:[#allocation10 + $0x1b0] sm:$0xf]  ;;  %v4127_v52 = vld [vmem:[#allocation10 + $0x524] sm:$0xf0]  ;;  %v3968_v61 = vld [vmem:[#allocation10 + $0x34] sm:$0xf] }
  0x65   :  { %610 = vmatpush.bf16.msrb.mxu1 %v2821_v9  ;;  %v2940_v9 = vld [vmem:[#allocation10] sm:$0xf]  ;;  %v3589_v53 = vor.u32 %v4127_v52, %v3588_v50  ;;  %v3348_v58 = vld [vmem:[#allocation10 + $0x330] sm:$0xf]  ;;  %v4067_v59 = vld [vmem:[#allocation10 + $0x344] sm:$0xf0] }
  0x66   :  { %623 = vmatpush.bf16.msrb.mxu2 %v2697_v10  ;;  %v3965_v10 = vld [vmem:[#allocation10 + $0x14] sm:$0xf0]  ;;  %v3349_v60 = vor.u32 %v4067_v59, %v3348_v58  ;;  %v3564_v0 = vld [vmem:[#allocation10 + $0x4e0] sm:$0xf]  ;;  %v3182_v4 = vld [vmem:[#allocation10 + $0x1f8] sm:$0xf0] }
  0x67   :  { %636 = vmatpush.bf16.msrb.mxu3 %v2825_v11  ;;  %598 = vmatmul.bf16.vlgmr.msrb.gmra.mxu0 %v4535_v51  ;;  %v4004_v11 = vld [vmem:[#allocation10 + $0x154] sm:$0xf]  ;;  %v2941_v18 = vor.u32 %v3965_v10, %v2940_v9  ;;  %v3962_v9 = vld [vmem:[#allocation10 + $0x4] sm:$0xf]  ;;  %v2942_v10 = vld [vmem:[#allocation10 + $0x18] sm:$0xf0] }
  0x68   :  { %1830 = vmatpush.bf16.msra.mxu0 %v3109_v12  ;;  %611 = vmatmul.bf16.vlgmr.msrb.gmra.mxu1 %v4537_v55  ;;  %v3157_v12 = vor.u32 %v4019_v7, %v3156_v6  ;;  %v3113_v19 = vor.u32 %v4004_v11, %v3110_v13  ;;  %v3324_v6 = vld [vmem:[#allocation10 + $0x300] sm:$0xf]  ;;  %v4061_v7 = vld [vmem:[#allocation10 + $0x314] sm:$0xf0]  ;;  %v4100_v11 = vld [vmem:[#allocation10 + $0x454] sm:$0xf] }
  0x69   :  { %1843 = vmatpush.bf16.msra.mxu1 %v3301_v17  ;;  %624 = vmatmul.bf16.vlgmr.msrb.gmra.mxu2 %v4535_v51  ;;  %v3228_v51 = vld [vmem:[#allocation10 + $0x240] sm:$0xf]  ;;  %v3302_v17 = vld [vmem:[#allocation10 + $0x2e8] sm:$0xf0]  ;;  %v4109_v25 = vld [vmem:[#allocation10 + $0x494] sm:$0xf0] }
  0x6a   :  { %637 = vmatmul.bf16.vlgmr.msrb.gmra.mxu3 %v4537_v55  ;;  %1856 = vmatpush.bf16.msra.mxu2 %v3493_v20  ;;  %v3037_v55 = vor.u32 %v3989_v37, %v3036_v34  ;;  %v3229_v48 = vor.u32 %v4037_v41, %v3228_v51  ;;  %v3133_v20 = vor.u32 %v4013_v15, %v3132_v14  ;;  %v3038_v34 = vld [vmem:[#allocation10 + $0xd8] sm:$0xf0]  ;;  %v3980_v37 = vld [vmem:[#allocation10 + $0x94] sm:$0xf]  ;;  %v4133_v51 = vld [vmem:[#allocation10 + $0x554] sm:$0xf0] }
  0x6b   :  { %1869 = vmatpush.bf16.msra.mxu3 %v3685_v32  ;;  %v3305_v23 = vor.u32 %v4052_v16, %v3302_v17  ;;  %v3065_v32 = vor.u32 %v3992_v27, %v3062_v28  ;;  %v4034_v41 = vld [vmem:[#allocation10 + $0x244] sm:$0xf]  ;;  %v3494_v13 = vld [vmem:[#allocation10 + $0x468] sm:$0xf0]  ;;  %v3540_v15 = vld [vmem:[#allocation10 + $0x4b0] sm:$0xf] }
  0x6c   :  { %1831 = vmatpush.bf16.msra.mxu0 %v3085_v21  ;;  %v3998_v21 = vld [vmem:[#allocation10 + $0x124] sm:$0xf]  ;;  %v3497_v14 = vor.u32 %v4100_v11, %v3494_v13  ;;  %v4115_v16 = vld [vmem:[#allocation10 + $0x4c4] sm:$0xf0]  ;;  %v3516_v24 = vld [vmem:[#allocation10 + $0x480] sm:$0xf] }
  0x6d   :  { %1844 = vmatpush.bf16.msra.mxu1 %v3277_v26  ;;  %v3089_v26 = vor.u32 %v3998_v21, %v3086_v22  ;;  %v3541_v17 = vor.u32 %v4115_v16, %v3540_v15  ;;  %v4094_v21 = vld [vmem:[#allocation10 + $0x424] sm:$0xf]  ;;  %v3470_v22 = vld [vmem:[#allocation10 + $0x438] sm:$0xf0]  ;;  %v3398_v44 = vld [vmem:[#allocation10 + $0x3a8] sm:$0xf0] }
  0x6e   :  { %1857 = vmatpush.bf16.msra.mxu2 %v3469_v31  ;;  %v3254_v31 = vld [vmem:[#allocation10 + $0x288] sm:$0xf0]  ;;  %v4010_v27 = vld [vmem:[#allocation10 + $0x184] sm:$0xf]  ;;  %v3134_v28 = vld [vmem:[#allocation10 + $0x198] sm:$0xf0] }
  0x6f   :  { %1870 = vmatpush.bf16.msra.mxu3 %v3661_v42  ;;  %v3257_v35 = vor.u32 %v4040_v30, %v3254_v31  ;;  %v3613_v42 = vor.u32 %v4133_v51, %v3612_v40  ;;  %v3137_v30 = vor.u32 %v4010_v27, %v3134_v28  ;;  %v3686_v31 = vld [vmem:[#allocation10 + $0x5e8] sm:$0xf0]  ;;  %v3422_v40 = vld [vmem:[#allocation10 + $0x3d8] sm:$0xf0]  ;;  %v4070_v52 = vld [vmem:[#allocation10 + $0x364] sm:$0xf] }
  0x70   :  { %1832 = vmatpush.bf16.msra.mxu0 %v3061_v33  ;;  %v3986_v33 = vld [vmem:[#allocation10 + $0xc4] sm:$0xf]  ;;  %v4549_v50 = vld [vmem:[#allocation8] sm:$0xf]  ;;  %v4124_v59 = vld [vmem:[#allocation10 + $0x514] sm:$0xf] }
  0x71   :  { %1845 = vmatpush.bf16.msra.mxu1 %v3253_v38  ;;  %v3041_v36 = vor.u32 %v3986_v33, %v3038_v34  ;;  %v3014_v38 = vld [vmem:[#allocation10 + $0xa8] sm:$0xf0]  ;;  %v4088_v33 = vld [vmem:[#allocation10 + $0x3f4] sm:$0xf]  ;;  %v3326_v13 = vld [vmem:[#allocation10 + $0x318] sm:$0xf0] }
  0x72   :  { %1858 = vmatpush.bf16.msra.mxu2 %v3445_v43  ;;  %v3017_v39 = vor.u32 %v3980_v37, %v3014_v38  ;;  %v3230_v43 = vld [vmem:[#allocation10 + $0x258] sm:$0xf0]  ;;  %v3446_v34 = vld [vmem:[#allocation10 + $0x408] sm:$0xf0]  ;;  %s2668_s30 = sshll.u32 %s4634_s9, 4  ;;  %s2669_s30 = int_to_ptr.hbm [resolvable:$true] %s2668_s30 }
  0x73   :  { %1871 = vmatpush.bf16.msra.mxu3 %v3637_v54  ;;  %v4028_v54 = vld [vmem:[#allocation10 + $0x214] sm:$0xf]  ;;  %v3662_v37 = vld [vmem:[#allocation10 + $0x5b8] sm:$0xf0] }
  0x74   :  { %1833 = vmatpush.bf16.msra.mxu0 %v3037_v55  ;;  %v3233_v55 = vor.u32 %v4034_v41, %v3230_v43  ;;  %v4136_v41 = vld [vmem:[#allocation10 + $0x574] sm:$0xf] }
  0x75   :  { %1846 = vmatpush.bf16.msra.mxu1 %v3229_v48  ;;  %v2990_v48 = vld [vmem:[#allocation10 + $0x78] sm:$0xf0] }
  0x76   :  { %1859 = vmatpush.bf16.msra.mxu2 %v3421_v56  ;;  %v2993_v49 = vor.u32 %v3974_v46, %v2990_v48  ;;  %v3206_v56 = vld [vmem:[#allocation10 + $0x228] sm:$0xf0]  ;;  %v4547_v46 = vld [vmem:[#allocation7] sm:$0xf]  ;;  %v3614_v48 = vld [vmem:[#allocation10 + $0x558] sm:$0xf0] }
  0x77   :  { %1872 = vmatpush.bf16.msra.mxu3 %v3613_v42  ;;  %v3638_v42 = vld [vmem:[#allocation10 + $0x588] sm:$0xf0]  ;;  %v645_v11 = vperm.slane %v4547_v46, 1 }
  0x78   :  { %1834 = vmatpush.bf16.msra.mxu0 %v3013_v57  ;;  %v3209_v57 = vor.u32 %v4028_v54, %v3206_v56  ;;  %v3641_v43 = vor.u32 %v4136_v41, %v3638_v42  ;;  %v644_v56 = vperm.slane %v4547_v46, 0 }
  0x79   :  { %1847 = vmatpush.bf16.msra.mxu1 %v3205_v62  ;;  %v2966_v62 = vld [vmem:[#allocation10 + $0x48] sm:$0xf0] }
  0x7a   :  { %1860 = vmatpush.bf16.msra.mxu2 %v3397_v1  ;;  %v2969_v63 = vor.u32 %v3968_v61, %v2966_v62  ;;  %v4121_v1 = vld [vmem:[#allocation10 + $0x4f4] sm:$0xf0]  ;;  %v658_v62 = vperm.slane %v4549_v50, 0 }
  0x7b   :  { %1873 = vmatpush.bf16.msra.mxu3 %v3589_v53  ;;  %v3565_v3 = vor.u32 %v4121_v1, %v3564_v0  ;;  %v3374_v53 = vld [vmem:[#allocation10 + $0x378] sm:$0xf0]  ;;  %v4064_v0 = vld [vmem:[#allocation10 + $0x334] sm:$0xf]  ;;  %v3350_v1 = vld [vmem:[#allocation10 + $0x348] sm:$0xf0] }
  0x7c   :  { %1835 = vmatpush.bf16.msra.mxu0 %v2989_v2  ;;  %v4022_v2 = vld [vmem:[#allocation10 + $0x1e4] sm:$0xf] }
  0x7d   :  { %1848 = vmatpush.bf16.msra.mxu1 %v3181_v5  ;;  %v3185_v5 = vor.u32 %v4022_v2, %v3182_v4  ;;  %v4118_v4 = vld [vmem:[#allocation10 + $0x4e4] sm:$0xf] }
  0x7e   :  { %1861 = vmatpush.bf16.msra.mxu2 %v3373_v47  ;;  %v4130_v47 = vld [vmem:[#allocation10 + $0x544] sm:$0xf] }
  0x7f   :  { %1874 = vmatpush.bf16.msra.mxu3 %v3565_v3  ;;  %v3353_v3 = vor.u32 %v4064_v0, %v3350_v1  ;;  %v646_v0 = vperm.slane %v4547_v46, 2 }
  0x80   :  { %1836 = vmatpush.bf16.msra.mxu0 %v2965_v8  ;;  %v3325_v8 = vor.u32 %v4061_v7, %v3324_v6  ;;  %v3116_v7 = vld [vmem:[#allocation10 + $0x158] sm:$0xf] }
  0x81   :  { %1849 = vmatpush.bf16.msra.mxu1 %v3157_v12  ;;  %v2945_v12 = vor.u32 %v3962_v9, %v2942_v10 }
  0x82   :  { %1862 = vmatpush.bf16.msra.mxu2 %v3349_v60  ;;  %v3590_v60 = vld [vmem:[#allocation10 + $0x528] sm:$0xf0] }
  0x83   :  { %1875 = vmatpush.bf16.msra.mxu3 %v3541_v17 }
  0x84   :  { %1837 = vmatpush.bf16.msra.mxu0 %v2941_v18  ;;  %v4016_v18 = vld [vmem:[#allocation10 + $0x1b4] sm:$0xf] }
  0x85   :  { %1850 = vmatpush.bf16.msra.mxu1 %v3133_v20 }
  0x86   :  { %1863 = vmatpush.bf16.msra.mxu2 %v3325_v8  ;;  %v4008_v8 = vld [vmem:[#allocation10 + $0x16c] sm:$0xf0] }
  0x88   :  { %1882 = vmatpush.bf16.msrb.mxu0 %v3113_v19  ;;  %v3158_v19 = vld [vmem:[#allocation10 + $0x1c8] sm:$0xf0] }
  0x89   :  { %1895 = vmatpush.bf16.msrb.mxu1 %v3305_v23  ;;  %v3161_v20 = vor.u32 %v4016_v18, %v3158_v19  ;;  %v3473_v23 = vor.u32 %v4094_v21, %v3470_v22  ;;  %v659_v19 = vperm.slane %v4549_v50, 1  ;;  %v3092_v21 = vld [vmem:[#allocation10 + $0x128] sm:$0xf] }
  0x8a   :  { %1908 = vmatpush.bf16.msrb.mxu2 %v3497_v14 }
  0x8c   :  { %1883 = vmatpush.bf16.msrb.mxu0 %v3089_v26  ;;  %v3517_v26 = vor.u32 %v4109_v25, %v3516_v24  ;;  %v4002_v24 = vld [vmem:[#allocation10 + $0x13c] sm:$0xf0]  ;;  %v4112_v25 = vld [vmem:[#allocation10 + $0x4b4] sm:$0xf] }
  0x8d   :  { %1896 = vmatpush.bf16.msrb.mxu1 %v3281_v29  ;;  %v4148_v29 = vld [vmem:[#allocation10 + $0x5d4] sm:$0xf] }
  0x8e   :  { %1909 = vmatpush.bf16.msrb.mxu2 %v3473_v23  ;;  %1876 = vmatpush.bf16.msra.mxu3 %v3517_v26  ;;  %v3542_v26 = vld [vmem:[#allocation10 + $0x4c8] sm:$0xf0] }
  0x8f   :  { %v3545_v28 = vor.u32 %v4112_v25, %v3542_v26 }
  0x90   :  { %1884 = vmatpush.bf16.msrb.mxu0 %v3065_v32  ;;  %v3689_v32 = vor.u32 %v4148_v29, %v3686_v31  ;;  %v3308_v29 = vld [vmem:[#allocation10 + $0x2d8] sm:$0xf]  ;;  %v3093_v31 = vor.u32 %v4002_v24, %v3092_v21 }
  0x91   :  { %1897 = vmatpush.bf16.msrb.mxu1 %v3257_v35  ;;  %v3449_v35 = vor.u32 %v4088_v33, %v3446_v34  ;;  %v4106_v33 = vld [vmem:[#allocation10 + $0x484] sm:$0xf]  ;;  %v3518_v34 = vld [vmem:[#allocation10 + $0x498] sm:$0xf0] }
  0x92   :  { %1921 = vmatpush.bf16.msrb.mxu3 %v3689_v32  ;;  %v4056_v32 = vld [vmem:[#allocation10 + $0x2ec] sm:$0xf0] }
  0x93   :  { %1910 = vmatpush.bf16.msrb.mxu2 %v3449_v35  ;;  %v3068_v35 = vld [vmem:[#allocation10 + $0xf8] sm:$0xf] }
  0x94   :  { %1885 = vmatpush.bf16.msrb.mxu0 %v3041_v36  ;;  %v4142_v36 = vld [vmem:[#allocation10 + $0x5a4] sm:$0xf] }
  0x95   :  { %1898 = vmatpush.bf16.msrb.mxu1 %v3233_v55  ;;  %v3665_v38 = vor.u32 %v4142_v36, %v3662_v37  ;;  %v4076_v55 = vld [vmem:[#allocation10 + $0x394] sm:$0xf]  ;;  %v3996_v36 = vld [vmem:[#allocation10 + $0x10c] sm:$0xf0]  ;;  %v3521_v37 = vor.u32 %v4106_v33, %v3518_v34 }
  0x96   :  { %v3401_v45 = vor.u32 %v4076_v55, %v3398_v44  ;;  %v3069_v42 = vor.u32 %v3996_v36, %v3068_v35  ;;  %v4050_v55 = vld [vmem:[#allocation10 + $0x2bc] sm:$0xf0]  ;;  %v3044_v44 = vld [vmem:[#allocation10 + $0xc8] sm:$0xf] }
  0x97   :  { %1922 = vmatpush.bf16.msrb.mxu3 %v3665_v38  ;;  %v3476_v36 = vld [vmem:[#allocation10 + $0x428] sm:$0xf] }
  0x98   :  { %1886 = vmatpush.bf16.msrb.mxu0 %v3017_v39  ;;  %v4082_v39 = vld [vmem:[#allocation10 + $0x3c4] sm:$0xf] }
  0x99   :  { %1899 = vmatpush.bf16.msrb.mxu1 %v3209_v57  ;;  %v3425_v51 = vor.u32 %v4082_v39, %v3422_v40  ;;  %v3377_v57 = vor.u32 %v4070_v52, %v3374_v53  ;;  %v3309_v40 = vor.u32 %v4056_v32, %v3308_v29  ;;  %v4044_v52 = vld [vmem:[#allocation10 + $0x28c] sm:$0xf0]  ;;  %v3020_v53 = vld [vmem:[#allocation10 + $0x98] sm:$0xf]  ;;  %v661_v32 = vperm.slane %v4549_v50, 3 }
  0x9a   :  { %v3164_v29 = vld [vmem:[#allocation10 + $0x1b8] sm:$0xf] }
  0x9b   :  { %1911 = vmatpush.bf16.msrb.mxu2 %v3425_v51  ;;  %1923 = vmatpush.bf16.msrb.mxu3 %v3641_v43  ;;  %v3284_v43 = vld [vmem:[#allocation10 + $0x2a8] sm:$0xf] }
  0x9c   :  { %1887 = vmatpush.bf16.msrb.mxu0 %v2993_v49  ;;  %v3617_v49 = vor.u32 %v4130_v47, %v3614_v48  ;;  %v3285_v47 = vor.u32 %v4050_v55, %v3284_v43  ;;  %v4014_v43 = vld [vmem:[#allocation10 + $0x19c] sm:$0xf0]  ;;  %v3692_v55 = vld [vmem:[#allocation10 + $0x5d8] sm:$0xf] }
  0x9d   :  { %1900 = vmatpush.bf16.msrb.mxu1 %v3185_v5  ;;  %v3566_v5 = vld [vmem:[#allocation10 + $0x4f8] sm:$0xf0] }
  0x9e   :  { %v3569_v9 = vor.u32 %v4118_v4, %v3566_v5  ;;  %v2972_v5 = vld [vmem:[#allocation10 + $0x38] sm:$0xf] }
  0x9f   :  { %1912 = vmatpush.bf16.msrb.mxu2 %v3401_v45  ;;  %1924 = vmatpush.bf16.msrb.mxu3 %v3617_v49  ;;  %v3990_v45 = vld [vmem:[#allocation10 + $0xdc] sm:$0xf0]  ;;  %v3260_v49 = vld [vmem:[#allocation10 + $0x278] sm:$0xf] }
  0xa0   :  { %1888 = vmatpush.bf16.msrb.mxu0 %v2969_v63  ;;  %v3593_v63 = vor.u32 %v4124_v59, %v3590_v60  ;;  %v3045_v48 = vor.u32 %v3990_v45, %v3044_v44  ;;  %v4038_v59 = vld [vmem:[#allocation10 + $0x25c] sm:$0xf0]  ;;  %v2996_v60 = vld [vmem:[#allocation10 + $0x68] sm:$0xf]  ;;  %v4152_v44 = vld [vmem:[#allocation10 + $0x5ec] sm:$0xf0] }
  0xa1   :  { %1901 = vmatpush.bf16.msrb.mxu1 %v3161_v20  ;;  %v3117_v20 = vor.u32 %v4008_v8, %v3116_v7  ;;  %v660_v8 = vperm.slane %v4549_v50, 2 }
  0xa3   :  { %1913 = vmatpush.bf16.msrb.mxu2 %v3377_v57  ;;  %1925 = vmatpush.bf16.msrb.mxu3 %v3593_v63 }
  0xa4   :  { %1889 = vmatpush.bf16.msrb.mxu0 %v2945_v12  ;;  %v4058_v12 = vld [vmem:[#allocation10 + $0x304] sm:$0xf] }
  0xa5   :  { %1902 = vmatpush.bf16.msrb.mxu1 %v3137_v30  ;;  %v3329_v17 = vor.u32 %v4058_v12, %v3326_v13  ;;  %v3188_v12 = vld [vmem:[#allocation10 + $0x1e8] sm:$0xf]  ;;  %v4026_v13 = vld [vmem:[#allocation10 + $0x1fc] sm:$0xf0] }
  0xa6   :  { %v3189_v24 = vor.u32 %v4026_v13, %v3188_v12  ;;  %v3644_v12 = vld [vmem:[#allocation10 + $0x578] sm:$0xf] }
  0xa7   :  { %1914 = vmatpush.bf16.msrb.mxu2 %v3353_v3  ;;  %1926 = vmatpush.bf16.msrb.mxu3 %v3569_v9  ;;  %v4032_v3 = vld [vmem:[#allocation10 + $0x22c] sm:$0xf0] }
  0xab   :  { %1915 = vmatpush.bf16.msrb.mxu2 %v3329_v17  ;;  %1927 = vmatpush.bf16.msrb.mxu3 %v3545_v28 }
  0xaf   :  { %1928 = vmatpush.bf16.msrb.mxu3 %v3521_v37 }
  0xc4   :  { %v547_v54 = vpop.f32.mrf.mxu0 }
  0xc5   :  { %v560_v58 = vpop.f32.mrf.mxu1 }
  0xc6   :  { %v561_v61 = vadd.f32 %v560_v58, %v547_v54  ;;  %v3984_v54 = vld [vmem:[#allocation10 + $0xac] sm:$0xf0]  ;;  %v3236_v58 = vld [vmem:[#allocation10 + $0x248] sm:$0xf] }
  0xc7   :  { %v3021_v57 = vor.u32 %v3984_v54, %v3020_v53  ;;  %v4092_v53 = vld [vmem:[#allocation10 + $0x40c] sm:$0xf0]  ;;  %v3993_v54 = vld [vmem:[#allocation10 + $0xfc] sm:$0xf] }
  0xc8   :  { %v652_v2 = vmul.f32 %v644_v56, %v561_v61  ;;  %v3261_v56 = vor.u32 %v4044_v52, %v3260_v49  ;;  %v3978_v61 = vld [vmem:[#allocation10 + $0x7c] sm:$0xf0]  ;;  %v3310_v49 = vld [vmem:[#allocation10 + $0x2f0] sm:$0xf0]  ;;  %v3452_v52 = vld [vmem:[#allocation10 + $0x3f8] sm:$0xf] }
  0xc9   :  { %v2997_v1 = vor.u32 %v3978_v61, %v2996_v60  ;;  %v3693_v61 = vor.u32 %v4152_v44, %v3692_v55  ;;  %v2974_v55 = vld [vmem:[#allocation10 + $0x50] sm:$0xf0]  ;;  %v3356_v44 = vld [vmem:[#allocation10 + $0x338] sm:$0xf] }
  0xca   :  { %v666_v6 = vadd.f32 %v658_v62, %v652_v2  ;;  %v3237_v62 = vor.u32 %v4038_v59, %v3236_v58  ;;  %v3212_v2 = vld [vmem:[#allocation10 + $0x218] sm:$0xf] }
  0xcb   :  { %v3213_v9 = vor.u32 %v4032_v3, %v3212_v2  ;;  %v3453_v2 = vor.u32 %v4092_v53, %v3452_v52  ;;  %v4122_v52 = vld [vmem:[#allocation10 + $0x4fc] sm:$0xf0]  ;;  %v4023_v53 = vld [vmem:[#allocation10 + $0x1ec] sm:$0xf] }
  0xcc   :  { %v573_v10 = vpop.f32.mrf.mxu2  ;;  %v670_v14 = vmax.f32 %v666_v6, 0.0  ;;  %v549_v16 = vpop.f32.mrf.mxu0  ;;  %v3972_v6 = vld [vmem:[#allocation10 + $0x4c] sm:$0xf0] }
  0xcd   :  { %v586_v15 = vpop.f32.mrf.mxu3  ;;  %v562_v22 = vpop.f32.mrf.mxu1  ;;  %v3500_v16 = vld [vmem:[#allocation10 + $0x458] sm:$0xf] }
  0xce   :  { %v587_v18 = vadd.f32 %v586_v15, %v573_v10  ;;  %v4555_v23 = vpack.c.bf16 %v670_v14, %v670_v14  ;;  %v2948_v14 = vld [vmem:[#allocation10 + $0x8] sm:$0xf]  ;;  %v3966_v15 = vld [vmem:[#allocation10 + $0x1c] sm:$0xf0]  ;;  %v647_v22 = vperm.slane %v4547_v46, 3 }
  0xcf   :  { %v2949_v28 = vor.u32 %v3966_v15, %v2948_v14  ;;  %v3094_v46 = vld [vmem:[#allocation10 + $0x140] sm:$0xf0]  ;;  %v4140_v15 = vld [vmem:[#allocation10 + $0x58c] sm:$0xf0] }
  0xd0   :  { %v653_v27 = vmul.f32 %v645_v11, %v587_v18  ;;  %1838 = vmatmul.bf16.vlgmr.msra.gmra.mxu0 %v4555_v23  ;;  %v2973_v11 = vor.u32 %v3972_v6, %v2972_v5  ;;  %v4104_v18 = vld [vmem:[#allocation10 + $0x46c] sm:$0xf0]  ;;  %v3286_v5 = vld [vmem:[#allocation10 + $0x2c0] sm:$0xf0]  ;;  %v3428_v6 = vld [vmem:[#allocation10 + $0x3c8] sm:$0xf] }
  0xd1   :  { %1934 = vmatpush.bf16.msra.mxu0 %v3117_v20  ;;  %v3118_v20 = vld [vmem:[#allocation10 + $0x170] sm:$0xf0]  ;;  %v3501_v34 = vor.u32 %v4104_v18, %v3500_v16  ;;  %v4041_v16 = vld [vmem:[#allocation10 + $0x27c] sm:$0xf] }
  0xd2   :  { %v667_v30 = vadd.f32 %v659_v19, %v653_v27  ;;  %v4005_v19 = vld [vmem:[#allocation10 + $0x15c] sm:$0xf] }
  0xd3   :  { %v3121_v35 = vor.u32 %v4005_v19, %v3118_v20  ;;  %v3981_v18 = vld [vmem:[#allocation10 + $0x9c] sm:$0xf]  ;;  %v3022_v19 = vld [vmem:[#allocation10 + $0xb0] sm:$0xf0]  ;;  %v3404_v20 = vld [vmem:[#allocation10 + $0x398] sm:$0xf] }
  0xd4   :  { %v671_v38 = vmax.f32 %v667_v30, 0.0  ;;  %v575_v39 = vpop.f32.mrf.mxu2  ;;  %v4020_v30 = vld [vmem:[#allocation10 + $0x1cc] sm:$0xf0] }
  0xd5   :  { %v588_v51 = vpop.f32.mrf.mxu3  ;;  %1935 = vmatpush.bf16.msra.mxu0 %v3093_v31  ;;  %v3999_v39 = vld [vmem:[#allocation10 + $0x12c] sm:$0xf] }
  0xd6   :  { %v4558_v41 = vpack.c.bf16 %v671_v38, %v671_v38  ;;  %v4098_v38 = vld [vmem:[#allocation10 + $0x43c] sm:$0xf0]  ;;  %v3165_v51 = vor.u32 %v4020_v30, %v3164_v29  ;;  %v3238_v29 = vld [vmem:[#allocation10 + $0x260] sm:$0xf0] }
  0xd7   :  { %v3477_v45 = vor.u32 %v4098_v38, %v3476_v36  ;;  %v3596_v38 = vld [vmem:[#allocation10 + $0x518] sm:$0xf] }
  0xd8   :  { %1851 = vmatmul.bf16.vlgmr.msra.gmra.mxu1 %v4558_v41 }
  0xd9   :  { %1947 = vmatpush.bf16.msra.mxu1 %v3309_v40  ;;  %1936 = vmatpush.bf16.msra.mxu0 %v3069_v42  ;;  %v3140_v42 = vld [vmem:[#allocation10 + $0x188] sm:$0xf] }
  0xda   :  { %v3141_v59 = vor.u32 %v4014_v43, %v3140_v42  ;;  %v3969_v43 = vld [vmem:[#allocation10 + $0x3c] sm:$0xf] }
  0xdd   :  { %1948 = vmatpush.bf16.msra.mxu1 %v3285_v47  ;;  %1937 = vmatpush.bf16.msra.mxu0 %v3045_v48  ;;  %v3097_v47 = vor.u32 %v3999_v39, %v3094_v46  ;;  %v4053_v48 = vld [vmem:[#allocation10 + $0x2dc] sm:$0xf]  ;;  %v4128_v46 = vld [vmem:[#allocation10 + $0x52c] sm:$0xf0] }
  0xe0   :  { %1890 = vmatmul.bf16.vlgmr.msrb.gmra.mxu0 %v4555_v23 }
  0xe1   :  { %1949 = vmatpush.bf16.msra.mxu1 %v3261_v56  ;;  %1938 = vmatpush.bf16.msra.mxu0 %v3021_v57  ;;  %v3070_v56 = vld [vmem:[#allocation10 + $0x110] sm:$0xf0] }
  0xe2   :  { %v3073_v3 = vor.u32 %v3993_v54, %v3070_v56  ;;  %v3190_v54 = vld [vmem:[#allocation10 + $0x200] sm:$0xf0] }
  0xe4   :  { %v599_v63 = vpop.f32.mrf.mxu0 }
  0xe5   :  { %v612_v4 = vpop.f32.mrf.mxu1  ;;  %1950 = vmatpush.bf16.msra.mxu1 %v3237_v62  ;;  %1939 = vmatpush.bf16.msra.mxu0 %v2997_v1  ;;  %v3313_v62 = vor.u32 %v4053_v48, %v3310_v49  ;;  %v3572_v48 = vld [vmem:[#allocation10 + $0x4e8] sm:$0xf]  ;;  %v2977_v49 = vor.u32 %v3969_v43, %v2974_v55  ;;  %v3052_v43 = vld [vmem:[#allocation10 + $0xd0] sm:$0xf] }
  0xe6   :  { %v613_v7 = vadd.f32 %v612_v4, %v599_v63  ;;  %v3668_v63 = vld [vmem:[#allocation10 + $0x5a8] sm:$0xf]  ;;  %v4047_v4 = vld [vmem:[#allocation10 + $0x2ac] sm:$0xf] }
  0xe7   :  { %v3991_v55 = vld [vmem:[#allocation10 + $0xe4] sm:$0xf0] }
  0xe8   :  { %v654_v10 = vmul.f32 %v646_v0, %v613_v7  ;;  %1903 = vmatmul.bf16.vlgmr.msrb.gmra.mxu1 %v4558_v41  ;;  %v4146_v0 = vld [vmem:[#allocation10 + $0x5bc] sm:$0xf0] }
  0xe9   :  { %1951 = vmatpush.bf16.msra.mxu1 %v3213_v9  ;;  %1940 = vmatpush.bf16.msra.mxu0 %v2973_v11  ;;  %v4086_v7 = vld [vmem:[#allocation10 + $0x3dc] sm:$0xf0]  ;;  %v3046_v9 = vld [vmem:[#allocation10 + $0xe0] sm:$0xf0]  ;;  %v3289_v11 = vor.u32 %v4047_v4, %v3286_v5  ;;  %v3548_v4 = vld [vmem:[#allocation10 + $0x4b8] sm:$0xf] }
  0xea   :  { %v668_v17 = vadd.f32 %v660_v8, %v654_v10  ;;  %v3987_v8 = vld [vmem:[#allocation10 + $0xcc] sm:$0xf]  ;;  %v3669_v10 = vor.u32 %v4146_v0, %v3668_v63  ;;  %v3429_v13 = vor.u32 %v4086_v7, %v3428_v6  ;;  %v3573_v63 = vor.u32 %v4122_v52, %v3572_v48  ;;  %v4116_v6 = vld [vmem:[#allocation10 + $0x4cc] sm:$0xf0]  ;;  %v4017_v7 = vld [vmem:[#allocation10 + $0x1bc] sm:$0xf] }
  0xeb   :  { %v3049_v14 = vor.u32 %v3987_v8, %v3046_v9  ;;  %v3193_v0 = vor.u32 %v4023_v53, %v3190_v54  ;;  %v3166_v8 = vld [vmem:[#allocation10 + $0x1d0] sm:$0xf0]  ;;  %v4137_v48 = vld [vmem:[#allocation10 + $0x57c] sm:$0xf]  ;;  %v3268_v53 = vld [vmem:[#allocation10 + $0x280] sm:$0xf] }
  0xec   :  { %v625_v21 = vpop.f32.mrf.mxu2  ;;  %v672_v25 = vmax.f32 %v668_v17, 0.0  ;;  %v601_v27 = vpop.f32.mrf.mxu0  ;;  %v3262_v17 = vld [vmem:[#allocation10 + $0x290] sm:$0xf0]  ;;  %v4045_v54 = vld [vmem:[#allocation10 + $0x294] sm:$0xf0] }
  0xed   :  { %v638_v26 = vpop.f32.mrf.mxu3  ;;  %v614_v33 = vpop.f32.mrf.mxu1  ;;  %1952 = vmatpush.bf16.msra.mxu1 %v3189_v24  ;;  %1941 = vmatpush.bf16.msra.mxu0 %v2949_v28  ;;  %v3265_v24 = vor.u32 %v4041_v16, %v3262_v17  ;;  %v4134_v27 = vld [vmem:[#allocation10 + $0x55c] sm:$0xf0]  ;;  %v4035_v28 = vld [vmem:[#allocation10 + $0x24c] sm:$0xf]  ;;  %v3169_v16 = vor.u32 %v4017_v7, %v3166_v8  ;;  %v3478_v17 = vld [vmem:[#allocation10 + $0x440] sm:$0xf0] }
  0xee   :  { %v639_v31 = vadd.f32 %v638_v26, %v625_v21  ;;  %v4567_v37 = vpack.c.bf16 %v672_v25, %v672_v25  ;;  %v4080_v21 = vld [vmem:[#allocation10 + $0x3ac] sm:$0xf0]  ;;  %v3620_v25 = vld [vmem:[#allocation10 + $0x548] sm:$0xf]  ;;  %v3025_v26 = vor.u32 %v3981_v18, %v3022_v19  ;;  %v3241_v36 = vor.u32 %v4035_v28, %v3238_v29  ;;  %v4110_v19 = vld [vmem:[#allocation10 + $0x49c] sm:$0xf0] }
  0xef   :  { %v3405_v30 = vor.u32 %v4080_v21, %v3404_v20  ;;  %v3380_v33 = vld [vmem:[#allocation10 + $0x368] sm:$0xf]  ;;  %v4011_v20 = vld [vmem:[#allocation10 + $0x18c] sm:$0xf]  ;;  %v3142_v21 = vld [vmem:[#allocation10 + $0x1a0] sm:$0xf0] }
  0xf0   :  { %v655_v40 = vmul.f32 %v647_v22, %v639_v31  ;;  %1864 = vmatmul.bf16.vlgmr.msra.gmra.mxu2 %v4567_v37  ;;  %1942 = vmatmul.bf16.vlgmr.msra.gmra.mxu0 %v4555_v23  ;;  %v3645_v22 = vor.u32 %v4140_v15, %v3644_v12  ;;  %v3975_v31 = vld [vmem:[#allocation10 + $0x6c] sm:$0xf]  ;;  %v3549_v15 = vor.u32 %v4116_v6, %v3548_v4  ;;  %v3524_v18 = vld [vmem:[#allocation10 + $0x488] sm:$0xf]  ;;  %v3076_v29 = vld [vmem:[#allocation10 + $0x100] sm:$0xf] }
  0xf1   :  { %1960 = vmatpush.bf16.msra.mxu2 %v3501_v34  ;;  %1986 = vmatpush.bf16.msrb.mxu0 %v3121_v35  ;;  %v4074_v34 = vld [vmem:[#allocation10 + $0x37c] sm:$0xf0]  ;;  %v3621_v35 = vor.u32 %v4134_v27, %v3620_v25  ;;  %v4095_v12 = vld [vmem:[#allocation10 + $0x42c] sm:$0xf]  ;;  %v3694_v25 = vld [vmem:[#allocation10 + $0x5f0] sm:$0xf0] }
  0xf2   :  { %v669_v50 = vadd.f32 %v661_v32, %v655_v40  ;;  %1953 = vmatpush.bf16.msra.mxu1 %v3165_v51  ;;  %v2998_v32 = vld [vmem:[#allocation10 + $0x80] sm:$0xf0]  ;;  %v4029_v40 = vld [vmem:[#allocation10 + $0x21c] sm:$0xf]  ;;  %v3214_v51 = vld [vmem:[#allocation10 + $0x230] sm:$0xf0]  ;;  %v3381_v42 = vor.u32 %v4074_v34, %v3380_v33  ;;  %v3481_v28 = vor.u32 %v4095_v12, %v3478_v17 }
  0xf3   :  { %v3001_v39 = vor.u32 %v3975_v31, %v2998_v32  ;;  %v4057_v27 = vld [vmem:[#allocation10 + $0x2f4] sm:$0xf0]  ;;  %v3525_v31 = vor.u32 %v4110_v19, %v3524_v18  ;;  %v3145_v32 = vor.u32 %v4011_v20, %v3142_v21  ;;  %v4089_v33 = vld [vmem:[#allocation10 + $0x3fc] sm:$0xf]  ;;  %v3454_v34 = vld [vmem:[#allocation10 + $0x410] sm:$0xf0] }
  0xf4   :  { %v673_v57 = vmax.f32 %v669_v50, 0.0  ;;  %v627_v58 = vpop.f32.mrf.mxu2  ;;  %v4068_v50 = vld [vmem:[#allocation10 + $0x34c] sm:$0xf0]  ;;  %v3646_v52 = vld [vmem:[#allocation10 + $0x590] sm:$0xf0] }
  0xf5   :  { %v640_v60 = vpop.f32.mrf.mxu3  ;;  %1961 = vmatpush.bf16.msra.mxu2 %v3477_v45  ;;  %1987 = vmatpush.bf16.msrb.mxu0 %v3097_v47  ;;  %v3597_v45 = vor.u32 %v4128_v46, %v3596_v38  ;;  %v3217_v47 = vor.u32 %v4029_v40, %v3214_v51  ;;  %v3357_v56 = vor.u32 %v4068_v50, %v3356_v44  ;;  %v3963_v58 = vld [vmem:[#allocation10 + $0xc] sm:$0xf]  ;;  %v3670_v46 = vld [vmem:[#allocation10 + $0x5c0] sm:$0xf0]  ;;  %v3292_v40 = vld [vmem:[#allocation10 + $0x2b0] sm:$0xf] }
  0xf6   :  { %v4571_v1 = vpack.c.bf16 %v673_v57, %v673_v57  ;;  %1954 = vmatpush.bf16.msra.mxu1 %v3141_v59  ;;  %v3332_v57 = vld [vmem:[#allocation10 + $0x308] sm:$0xf]  ;;  %v2950_v59 = vld [vmem:[#allocation10 + $0x20] sm:$0xf0]  ;;  %v4062_v60 = vld [vmem:[#allocation10 + $0x31c] sm:$0xf0] }
  0xf7   :  { %v2953_v5 = vor.u32 %v3963_v58, %v2950_v59  ;;  %v3333_v9 = vor.u32 %v4062_v60, %v3332_v57  ;;  %v4143_v38 = vld [vmem:[#allocation10 + $0x5ac] sm:$0xf]  ;;  %v4051_v51 = vld [vmem:[#allocation10 + $0x2c4] sm:$0xf0]  ;;  %v3430_v50 = vld [vmem:[#allocation10 + $0x3e0] sm:$0xf0] }
  0xf8   :  { %1877 = vmatmul.bf16.vlgmr.msra.gmra.mxu3 %v4571_v1  ;;  %v4083_v44 = vld [vmem:[#allocation10 + $0x3cc] sm:$0xf]  ;;  %v3028_v57 = vld [vmem:[#allocation10 + $0xa0] sm:$0xf]  ;;  %v3985_v58 = vld [vmem:[#allocation10 + $0xb4] sm:$0xf0] }
  0xf9   :  { %1973 = vmatpush.bf16.msra.mxu3 %v3693_v61  ;;  %1962 = vmatpush.bf16.msra.mxu2 %v3453_v2  ;;  %v3124_v61 = vld [vmem:[#allocation10 + $0x160] sm:$0xf]  ;;  %v4101_v2 = vld [vmem:[#allocation10 + $0x45c] sm:$0xf]  ;;  %v3406_v60 = vld [vmem:[#allocation10 + $0x3b0] sm:$0xf0] }
  0xfa   :  { %1999 = vmatpush.bf16.msrb.mxu1 %v3313_v62  ;;  %1988 = vmatpush.bf16.msrb.mxu0 %v3073_v3  ;;  %v4009_v62 = vld [vmem:[#allocation10 + $0x174] sm:$0xf0]  ;;  %v3502_v3 = vld [vmem:[#allocation10 + $0x470] sm:$0xf0]  ;;  %v4077_v59 = vld [vmem:[#allocation10 + $0x39c] sm:$0xf] }
  0xfb   :  { %1955 = vmatmul.bf16.vlgmr.msra.gmra.mxu1 %v4558_v41  ;;  %v4039_v4 = vld [vmem:[#allocation10 + $0x264] sm:$0xf0]  ;;  %v3004_v6 = vld [vmem:[#allocation10 + $0x70] sm:$0xf]  ;;  %v4071_v8 = vld [vmem:[#allocation10 + $0x36c] sm:$0xf] }
  0xfc   :  { %v3979_v7 = vld [vmem:[#allocation10 + $0x84] sm:$0xf0]  ;;  %v4125_v12 = vld [vmem:[#allocation10 + $0x51c] sm:$0xf]  ;;  %v2980_v18 = vld [vmem:[#allocation10 + $0x40] sm:$0xf] }
  0xfd   :  { %1974 = vmatpush.bf16.msra.mxu3 %v3669_v10  ;;  %1963 = vmatpush.bf16.msra.mxu2 %v3429_v13  ;;  %v3125_v10 = vor.u32 %v4009_v62, %v3124_v61  ;;  %v3100_v13 = vld [vmem:[#allocation10 + $0x130] sm:$0xf]  ;;  %v3649_v61 = vor.u32 %v4137_v48, %v3646_v52  ;;  %v3269_v62 = vor.u32 %v4045_v54, %v3268_v53  ;;  %v3973_v19 = vld [vmem:[#allocation10 + $0x54] sm:$0xf0]  ;;  %v4065_v20 = vld [vmem:[#allocation10 + $0x33c] sm:$0xf] }
  0xfe   :  { %2000 = vmatpush.bf16.msrb.mxu1 %v3289_v11  ;;  %1989 = vmatpush.bf16.msrb.mxu0 %v3049_v14  ;;  %v3505_v11 = vor.u32 %v4101_v2, %v3502_v3  ;;  %v4003_v14 = vld [vmem:[#allocation10 + $0x144] sm:$0xf0]  ;;  %v3622_v2 = vld [vmem:[#allocation10 + $0x560] sm:$0xf0]  ;;  %v3244_v3 = vld [vmem:[#allocation10 + $0x250] sm:$0xf] }
  0xff   :  { %v3358_v21 = vld [vmem:[#allocation10 + $0x350] sm:$0xf0]  ;;  %v3484_v48 = vld [vmem:[#allocation10 + $0x430] sm:$0xf]  ;;  %v3102_v52 = vld [vmem:[#allocation10 + $0x148] sm:$0xf0] }
 0x100   :  { %1916 = vmatmul.bf16.vlgmr.msrb.gmra.mxu2 %v4567_v37 }
 0x101   :  { %1975 = vmatpush.bf16.msra.mxu3 %v3645_v22  ;;  %1964 = vmatpush.bf16.msra.mxu2 %v3405_v30  ;;  %v4149_v22 = vld [vmem:[#allocation10 + $0x5dc] sm:$0xf]  ;;  %v3997_v30 = vld [vmem:[#allocation10 + $0x114] sm:$0xf0] }
 0x102   :  { %2001 = vmatpush.bf16.msrb.mxu1 %v3265_v24  ;;  %1990 = vmatpush.bf16.msrb.mxu0 %v3025_v26  ;;  %v3101_v24 = vor.u32 %v4003_v14, %v3100_v13  ;;  %v3316_v26 = vld [vmem:[#allocation10 + $0x2e0] sm:$0xf]  ;;  %v3005_v13 = vor.u32 %v3979_v7, %v3004_v6  ;;  %v3598_v14 = vld [vmem:[#allocation10 + $0x530] sm:$0xf0] }
 0x105   :  { %1976 = vmatpush.bf16.msra.mxu3 %v3621_v35  ;;  %1965 = vmatpush.bf16.msra.mxu2 %v3381_v42  ;;  %v3697_v35 = vor.u32 %v4149_v22, %v3694_v25  ;;  %v3457_v42 = vor.u32 %v4089_v33, %v3454_v34  ;;  %v3601_v22 = vor.u32 %v4125_v12, %v3598_v14  ;;  %v4119_v25 = vld [vmem:[#allocation10 + $0x4ec] sm:$0xf]  ;;  %v3967_v33 = vld [vmem:[#allocation10 + $0x24] sm:$0xf0]  ;;  %v3334_v34 = vld [vmem:[#allocation10 + $0x320] sm:$0xf0] }
 0x106   :  { %2002 = vmatpush.bf16.msrb.mxu1 %v3241_v36  ;;  %1991 = vmatpush.bf16.msrb.mxu0 %v3001_v39  ;;  %v3317_v36 = vor.u32 %v4057_v27, %v3316_v26  ;;  %v3077_v39 = vor.u32 %v3997_v30, %v3076_v29  ;;  %v2981_v26 = vor.u32 %v3973_v19, %v2980_v18  ;;  %v3574_v27 = vld [vmem:[#allocation10 + $0x500] sm:$0xf0]  ;;  %v4027_v29 = vld [vmem:[#allocation10 + $0x204] sm:$0xf0]  ;;  %v3676_v12 = vld [vmem:[#allocation10 + $0x5b0] sm:$0xf] }
 0x107   :  { %v3361_v30 = vor.u32 %v4065_v20, %v3358_v21  ;;  %v4147_v14 = vld [vmem:[#allocation10 + $0x5c4] sm:$0xf0]  ;;  %v3054_v18 = vld [vmem:[#allocation10 + $0xe8] sm:$0xf0] }
 0x108   :  { %1929 = vmatmul.bf16.vlgmr.msrb.gmra.mxu3 %v4571_v1  ;;  %v3677_v20 = vor.u32 %v4147_v14, %v3676_v12  ;;  %v4102_v12 = vld [vmem:[#allocation10 + $0x464] sm:$0xf]  ;;  %v3510_v14 = vld [vmem:[#allocation10 + $0x478] sm:$0xf0] }
 0x109   :  { %1977 = vmatpush.bf16.msra.mxu3 %v3597_v45  ;;  %1966 = vmatpush.bf16.msra.mxu2 %v3357_v56  ;;  %v3673_v45 = vor.u32 %v4143_v38, %v3670_v46  ;;  %v3433_v56 = vor.u32 %v4083_v44, %v3430_v50  ;;  %v3577_v38 = vor.u32 %v4119_v25, %v3574_v27  ;;  %v3508_v46 = vld [vmem:[#allocation10 + $0x460] sm:$0xf]  ;;  %v4021_v44 = vld [vmem:[#allocation10 + $0x1d4] sm:$0xf0] }
 0x10a   :  { %2003 = vmatpush.bf16.msrb.mxu1 %v3217_v47  ;;  %1992 = vmatpush.bf16.msrb.mxu0 %v2977_v49  ;;  %v3293_v47 = vor.u32 %v4051_v51, %v3292_v40  ;;  %v3053_v49 = vor.u32 %v3991_v55, %v3052_v43  ;;  %v4105_v40 = vld [vmem:[#allocation10 + $0x474] sm:$0xf0]  ;;  %v4113_v51 = vld [vmem:[#allocation10 + $0x4bc] sm:$0xf]  ;;  %v3550_v43 = vld [vmem:[#allocation10 + $0x4d0] sm:$0xf0] }
 0x10b   :  { %v3172_v55 = vld [vmem:[#allocation10 + $0x1c0] sm:$0xf]  ;;  %v3553_v53 = vor.u32 %v4113_v51, %v3550_v43  ;;  %v4141_v27 = vld [vmem:[#allocation10 + $0x594] sm:$0xf0]  ;;  %v3246_v51 = vld [vmem:[#allocation10 + $0x268] sm:$0xf0] }
 0x10c   :  { %v3173_v54 = vor.u32 %v4021_v44, %v3172_v55  ;;  %v3652_v25 = vld [vmem:[#allocation10 + $0x580] sm:$0xf]  ;;  %v3006_v43 = vld [vmem:[#allocation10 + $0x88] sm:$0xf0] }
 0x10d   :  { %1978 = vmatpush.bf16.msra.mxu3 %v3573_v63  ;;  %1967 = vmatpush.bf16.msra.mxu2 %v3333_v9  ;;  %v4131_v63 = vld [vmem:[#allocation10 + $0x54c] sm:$0xf]  ;;  %v3382_v9 = vld [vmem:[#allocation10 + $0x380] sm:$0xf0] }
 0x10e   :  { %2004 = vmatpush.bf16.msrb.mxu1 %v3193_v0  ;;  %1993 = vmatpush.bf16.msrb.mxu0 %v2953_v5  ;;  %v3029_v0 = vor.u32 %v3985_v58, %v3028_v57  ;;  %v3409_v5 = vor.u32 %v4077_v59, %v3406_v60  ;;  %v3385_v17 = vor.u32 %v4071_v8, %v3382_v9  ;;  %v4107_v57 = vld [vmem:[#allocation10 + $0x48c] sm:$0xf]  ;;  %v3526_v58 = vld [vmem:[#allocation10 + $0x4a0] sm:$0xf0]  ;;  %v3148_v59 = vld [vmem:[#allocation10 + $0x190] sm:$0xf] }
 0x10f   :  { %v4015_v60 = vld [vmem:[#allocation10 + $0x1a4] sm:$0xf0]  ;;  %v3529_v6 = vor.u32 %v4107_v57, %v3526_v58  ;;  %v2982_v57 = vld [vmem:[#allocation10 + $0x58] sm:$0xf0] }
 0x110   :  { %1968 = vmatmul.bf16.vlgmr.msra.gmra.mxu2 %v4567_v37  ;;  %v3149_v7 = vor.u32 %v4015_v60, %v3148_v59 }
 0x111   :  { %2012 = vmatpush.bf16.msrb.mxu2 %v3505_v11  ;;  %1979 = vmatpush.bf16.msra.mxu3 %v3549_v15  ;;  %v3245_v11 = vor.u32 %v4039_v4, %v3244_v3  ;;  %v3220_v15 = vld [vmem:[#allocation10 + $0x220] sm:$0xf]  ;;  %v3994_v4 = vld [vmem:[#allocation10 + $0x104] sm:$0xf] }
 0x112   :  { %2038 = vmatpush.bf16.msra.mxu0 %v3125_v10  ;;  %2005 = vmatpush.bf16.msrb.mxu1 %v3169_v16  ;;  %v3625_v10 = vor.u32 %v4131_v63, %v3622_v2  ;;  %v4033_v16 = vld [vmem:[#allocation10 + $0x234] sm:$0xf0]  ;;  %v3318_v2 = vld [vmem:[#allocation10 + $0x2f8] sm:$0xf0] }
 0x113   :  { %1994 = vmatmul.bf16.vlgmr.msrb.gmra.mxu0 %v4555_v23  ;;  %v4153_v63 = vld [vmem:[#allocation10 + $0x5f4] sm:$0xf0] }
 0x115   :  { %2013 = vmatpush.bf16.msrb.mxu2 %v3481_v28  ;;  %1980 = vmatpush.bf16.msra.mxu3 %v3525_v31  ;;  %v3196_v28 = vld [vmem:[#allocation10 + $0x1f0] sm:$0xf]  ;;  %v4059_v31 = vld [vmem:[#allocation10 + $0x30c] sm:$0xf] }
 0x116   :  { %2039 = vmatpush.bf16.msra.mxu0 %v3101_v24  ;;  %2006 = vmatpush.bf16.msrb.mxu1 %v3145_v32  ;;  %v3221_v24 = vor.u32 %v4033_v16, %v3220_v15  ;;  %v2956_v32 = vld [vmem:[#allocation10 + $0x10] sm:$0xf]  ;;  %v3337_v50 = vor.u32 %v4059_v31, %v3334_v34  ;;  %v4048_v15 = vld [vmem:[#allocation10 + $0x2b4] sm:$0xf]  ;;  %v3294_v16 = vld [vmem:[#allocation10 + $0x2c8] sm:$0xf0] }
 0x117   :  { %v3297_v21 = vor.u32 %v4048_v15, %v3294_v16  ;;  %v3030_v31 = vld [vmem:[#allocation10 + $0xb8] sm:$0xf0]  ;;  %v3556_v15 = vld [vmem:[#allocation10 + $0x4c0] sm:$0xf]  ;;  %v4117_v16 = vld [vmem:[#allocation10 + $0x4d4] sm:$0xf0] }
 0x118   :  { %1981 = vmatmul.bf16.vlgmr.msra.gmra.mxu3 %v4571_v1 }
 0x119   :  { %2025 = vmatpush.bf16.msrb.mxu3 %v3697_v35  ;;  %2007 = vmatmul.bf16.vlgmr.msrb.gmra.mxu1 %v4558_v41  ;;  %v4006_v35 = vld [vmem:[#allocation10 + $0x164] sm:$0xf] }
 0x11a   :  { %2051 = vmatpush.bf16.msra.mxu1 %v3317_v36  ;;  %2040 = vmatpush.bf16.msra.mxu0 %v3077_v39  ;;  %v3126_v36 = vld [vmem:[#allocation10 + $0x178] sm:$0xf0]  ;;  %v3197_v39 = vor.u32 %v4027_v29, %v3196_v28  ;;  %v4042_v28 = vld [vmem:[#allocation10 + $0x284] sm:$0xf] }
 0x11b   :  { %2014 = vmatpush.bf16.msrb.mxu2 %v3457_v42  ;;  %v2957_v42 = vor.u32 %v3967_v33, %v2956_v32  ;;  %v3270_v29 = vld [vmem:[#allocation10 + $0x298] sm:$0xf0]  ;;  %v3653_v33 = vor.u32 %v4141_v27, %v3652_v25  ;;  %v4161_v25 = vld [vmem:[#allocation14 + $0x38] sm:$0xff]  ;;  %v3532_v27 = vld [vmem:[#allocation10 + $0x490] sm:$0xf] }
 0x11c   :  { %v3273_v34 = vor.u32 %v4042_v28, %v3270_v29  ;;  %v4111_v28 = vld [vmem:[#allocation10 + $0x4a4] sm:$0xf0]  ;;  %v4012_v29 = vld [vmem:[#allocation10 + $0x194] sm:$0xf] }
 0x11d   :  { %2026 = vmatpush.bf16.msrb.mxu3 %v3673_v45  ;;  %v3129_v45 = vor.u32 %v4006_v35, %v3126_v36  ;;  %v3412_v35 = vld [vmem:[#allocation10 + $0x3a0] sm:$0xf]  ;;  %v4081_v36 = vld [vmem:[#allocation10 + $0x3b4] sm:$0xf0] }
 0x11e   :  { %2052 = vmatpush.bf16.msra.mxu1 %v3293_v47  ;;  %2041 = vmatpush.bf16.msra.mxu0 %v3053_v49  ;;  %v3509_v47 = vor.u32 %v4105_v40, %v3508_v46  ;;  %v4000_v49 = vld [vmem:[#allocation10 + $0x134] sm:$0xf]  ;;  %v4135_v46 = vld [vmem:[#allocation10 + $0x564] sm:$0xf0]  ;;  %v3413_v55 = vor.u32 %v4081_v36, %v3412_v35  ;;  %v4160_v35 = vld [vmem:[#allocation14 + $0x30] sm:$0xff] }
 0x11f   :  { %2015 = vmatpush.bf16.msrb.mxu2 %v3433_v56  ;;  %v4099_v56 = vld [vmem:[#allocation10 + $0x444] sm:$0xf0]  ;;  %v4036_v40 = vld [vmem:[#allocation10 + $0x254] sm:$0xf] }
 0x120   :  { %v3485_v3 = vor.u32 %v4099_v56, %v3484_v48  ;;  %v3604_v48 = vld [vmem:[#allocation10 + $0x520] sm:$0xf]  ;;  %v3970_v56 = vld [vmem:[#allocation10 + $0x44] sm:$0xf] }
 0x121   :  { %2027 = vmatpush.bf16.msrb.mxu3 %v3649_v61  ;;  %v3700_v61 = vld [vmem:[#allocation10 + $0x5e0] sm:$0xf] }
 0x122   :  { %2053 = vmatpush.bf16.msra.mxu1 %v3269_v62  ;;  %2042 = vmatpush.bf16.msra.mxu0 %v3029_v0  ;;  %v3105_v62 = vor.u32 %v4000_v49, %v3102_v52  ;;  %v4054_v0 = vld [vmem:[#allocation10 + $0x2e4] sm:$0xf]  ;;  %v3701_v8 = vor.u32 %v4153_v63, %v3700_v61  ;;  %v4129_v52 = vld [vmem:[#allocation10 + $0x534] sm:$0xf0]  ;;  %v3364_v61 = vld [vmem:[#allocation10 + $0x340] sm:$0xf] }
 0x123   :  { %2016 = vmatpush.bf16.msrb.mxu2 %v3409_v5  ;;  %v3078_v5 = vld [vmem:[#allocation10 + $0x118] sm:$0xf0]  ;;  %v3321_v9 = vor.u32 %v4054_v0, %v3318_v2  ;;  %v3605_v59 = vor.u32 %v4129_v52, %v3604_v48  ;;  %v3580_v63 = vld [vmem:[#allocation10 + $0x4f0] sm:$0xf]  ;;  %v2985_v0 = vor.u32 %v3970_v56, %v2982_v57  ;;  %v4123_v2 = vld [vmem:[#allocation10 + $0x504] sm:$0xf0] }
 0x124   :  { %v4158_v48 = vld [vmem:[#allocation14 + $0x20] sm:$0xff]  ;;  %v4132_v56 = vld [vmem:[#allocation10 + $0x554] sm:$0xf] }
 0x125   :  { %2028 = vmatpush.bf16.msrb.mxu3 %v3625_v10  ;;  %v3460_v10 = vld [vmem:[#allocation10 + $0x400] sm:$0xf]  ;;  %v3630_v57 = vld [vmem:[#allocation10 + $0x568] sm:$0xf0] }
 0x126   :  { %2054 = vmatpush.bf16.msra.mxu1 %v3245_v11  ;;  %2043 = vmatpush.bf16.msra.mxu0 %v3005_v13  ;;  %v4093_v11 = vld [vmem:[#allocation10 + $0x414] sm:$0xf0]  ;;  %v3081_v13 = vor.u32 %v3994_v4, %v3078_v5  ;;  %v3198_v4 = vld [vmem:[#allocation10 + $0x208] sm:$0xf0]  ;;  %v3964_v5 = vld [vmem:[#allocation10 + $0x14] sm:$0xf] }
 0x127   :  { %2017 = vmatpush.bf16.msrb.mxu2 %v3385_v17  ;;  %v3988_v17 = vld [vmem:[#allocation10 + $0xd4] sm:$0xf]  ;;  %v3461_v19 = vor.u32 %v4093_v11, %v3460_v10  ;;  %v3340_v10 = vld [vmem:[#allocation10 + $0x310] sm:$0xf]  ;;  %v4063_v11 = vld [vmem:[#allocation10 + $0x324] sm:$0xf0] }
 0x129   :  { %2029 = vmatpush.bf16.msrb.mxu3 %v3601_v22  ;;  %v3436_v22 = vld [vmem:[#allocation10 + $0x3d0] sm:$0xf] }
 0x12a   :  { %2055 = vmatpush.bf16.msra.mxu1 %v3221_v24  ;;  %2044 = vmatpush.bf16.msra.mxu0 %v2981_v26  ;;  %v4087_v24 = vld [vmem:[#allocation10 + $0x3e4] sm:$0xf0]  ;;  %v3057_v26 = vor.u32 %v3988_v17, %v3054_v18  ;;  %v4018_v17 = vld [vmem:[#allocation10 + $0x1c4] sm:$0xf]  ;;  %v3174_v18 = vld [vmem:[#allocation10 + $0x1d8] sm:$0xf0] }
 0x12b   :  { %2018 = vmatpush.bf16.msrb.mxu2 %v3361_v30  ;;  %v3982_v30 = vld [vmem:[#allocation10 + $0xa4] sm:$0xf]  ;;  %v3437_v32 = vor.u32 %v4087_v24, %v3436_v22  ;;  %v4096_v22 = vld [vmem:[#allocation10 + $0x434] sm:$0xf]  ;;  %v3486_v24 = vld [vmem:[#allocation10 + $0x448] sm:$0xf0] }
 0x12d   :  { %2030 = vmatpush.bf16.msrb.mxu3 %v3577_v38  ;;  %v3628_v38 = vld [vmem:[#allocation10 + $0x550] sm:$0xf] }
 0x12e   :  { %2056 = vmatpush.bf16.msra.mxu1 %v3197_v39  ;;  %2045 = vmatpush.bf16.msra.mxu0 %v2957_v42  ;;  %v3033_v39 = vor.u32 %v3982_v30, %v3030_v31  ;;  %v3976_v42 = vld [vmem:[#allocation10 + $0x74] sm:$0xf]  ;;  %v3629_v44 = vor.u32 %v4135_v46, %v3628_v38  ;;  %v3150_v30 = vld [vmem:[#allocation10 + $0x1a8] sm:$0xf0]  ;;  %v4150_v31 = vld [vmem:[#allocation10 + $0x5e4] sm:$0xf] }
 0x12f   :  { %2019 = vmatpush.bf16.msrb.mxu2 %v3337_v50  ;;  %v3249_v50 = vor.u32 %v4036_v40, %v3246_v51  ;;  %v3009_v49 = vor.u32 %v3976_v42, %v3006_v43  ;;  %v3153_v36 = vor.u32 %v4012_v29, %v3150_v30  ;;  %v3462_v46 = vld [vmem:[#allocation10 + $0x418] sm:$0xf0]  ;;  %v4144_v40 = vld [vmem:[#allocation10 + $0x5b4] sm:$0xf]  ;;  %v3678_v51 = vld [vmem:[#allocation10 + $0x5c8] sm:$0xf0] }
 0x130   :  { %v4159_v43 = vld [vmem:[#allocation14 + $0x28] sm:$0xff]  ;;  %v4165_v29 = vld [vmem:[#allocation14 + $0x58] sm:$0xff] }
 0x131   :  { %2031 = vmatpush.bf16.msrb.mxu3 %v3553_v53  ;;  %2046 = vmatmul.bf16.vlgmr.msra.gmra.mxu0 %v4555_v23  ;;  %v4030_v53 = vld [vmem:[#allocation10 + $0x224] sm:$0xf] }
 0x132   :  { %2090 = vmatpush.bf16.msrb.mxu0 %v3129_v45  ;;  %2057 = vmatpush.bf16.msra.mxu1 %v3173_v54  ;;  %v3388_v45 = vld [vmem:[#allocation10 + $0x370] sm:$0xf]  ;;  %v3222_v54 = vld [vmem:[#allocation10 + $0x238] sm:$0xf0]  ;;  %v4177_v30 = vld [vmem:[#allocation14 + $0xb8] sm:$0xff] }
 0x133   :  { %2064 = vmatpush.bf16.msra.mxu2 %v3509_v47  ;;  %v4075_v47 = vld [vmem:[#allocation10 + $0x384] sm:$0xf0]  ;;  %v3225_v60 = vor.u32 %v4030_v53, %v3222_v54  ;;  %v4078_v53 = vld [vmem:[#allocation10 + $0x3a4] sm:$0xf]  ;;  %v3414_v54 = vld [vmem:[#allocation10 + $0x3b8] sm:$0xf0] }
 0x134   :  { %2020 = vmatmul.bf16.vlgmr.msrb.gmra.mxu2 %v4567_v37  ;;  %v3389_v58 = vor.u32 %v4075_v47, %v3388_v45  ;;  %v3654_v47 = vld [vmem:[#allocation10 + $0x598] sm:$0xf0] }
 0x135   :  { %2032 = vmatpush.bf16.msrb.mxu3 %v3529_v6  ;;  %v2958_v6 = vld [vmem:[#allocation10 + $0x28] sm:$0xf0] }
 0x136   :  { %2091 = vmatpush.bf16.msrb.mxu0 %v3105_v62  ;;  %2058 = vmatpush.bf16.msra.mxu1 %v3149_v7  ;;  %v4069_v62 = vld [vmem:[#allocation10 + $0x354] sm:$0xf0] }
 0x137   :  { %2065 = vmatpush.bf16.msra.mxu2 %v3485_v3  ;;  %v4024_v3 = vld [vmem:[#allocation10 + $0x1f4] sm:$0xf]  ;;  %v3365_v7 = vor.u32 %v4069_v62, %v3364_v61  ;;  %v3633_v62 = vor.u32 %v4132_v56, %v3630_v57 }
 0x138   :  { %2033 = vmatmul.bf16.vlgmr.msrb.gmra.mxu3 %v4571_v1  ;;  %v4171_v57 = vld [vmem:[#allocation14 + $0x88] sm:$0xff] }
 0x139   :  { %2077 = vmatpush.bf16.msra.mxu3 %v3701_v8  ;;  %2059 = vmatmul.bf16.vlgmr.msra.gmra.mxu1 %v4558_v41  ;;  %v3581_v8 = vor.u32 %v4123_v2, %v3580_v63  ;;  %v4072_v63 = vld [vmem:[#allocation10 + $0x374] sm:$0xf]  ;;  %v4126_v2 = vld [vmem:[#allocation10 + $0x524] sm:$0xf] }
 0x13a   :  { %2103 = vmatpush.bf16.msrb.mxu1 %v3321_v9  ;;  %2092 = vmatpush.bf16.msrb.mxu0 %v3081_v13  ;;  %v3201_v9 = vor.u32 %v4024_v3, %v3198_v4  ;;  %v2961_v13 = vor.u32 %v3964_v5, %v2958_v6  ;;  %v3606_v3 = vld [vmem:[#allocation10 + $0x538] sm:$0xf0] }
 0x13b   :  { %2066 = vmatpush.bf16.msra.mxu2 %v3461_v19  ;;  %v3341_v19 = vor.u32 %v4063_v11, %v3340_v10  ;;  %v4156_v5 = vld [vmem:[#allocation14 + $0x10] sm:$0xff]  ;;  %v4120_v10 = vld [vmem:[#allocation10 + $0x4f4] sm:$0xf]  ;;  %v3582_v11 = vld [vmem:[#allocation10 + $0x508] sm:$0xf0] }
 0x13c   :  { %v4168_v6 = vld [vmem:[#allocation14 + $0x70] sm:$0xff] }
 0x13d   :  { %2078 = vmatpush.bf16.msra.mxu3 %v3677_v20  ;;  %v3513_v20 = vor.u32 %v4102_v12, %v3510_v14  ;;  %v4167_v14 = vld [vmem:[#allocation14 + $0x68] sm:$0xff] }
 0x13e   :  { %2104 = vmatpush.bf16.msrb.mxu1 %v3297_v21  ;;  %2093 = vmatpush.bf16.msrb.mxu0 %v3057_v26  ;;  %v3557_v21 = vor.u32 %v4117_v16, %v3556_v15  ;;  %v3177_v26 = vor.u32 %v4018_v17, %v3174_v18  ;;  %v3585_v16 = vor.u32 %v4120_v10, %v3582_v11  ;;  %v4060_v17 = vld [vmem:[#allocation10 + $0x314] sm:$0xf]  ;;  %v3342_v18 = vld [vmem:[#allocation10 + $0x328] sm:$0xf0] }
 0x13f   :  { %2067 = vmatpush.bf16.msra.mxu2 %v3437_v32  ;;  %v3702_v32 = vld [vmem:[#allocation10 + $0x5f8] sm:$0xf0]  ;;  %v4182_v10 = vld [vmem:[#allocation14 + $0xe0] sm:$0xff] }
 0x140   :  { %v3705_v38 = vor.u32 %v4150_v31, %v3702_v32 }
 0x141   :  { %2079 = vmatpush.bf16.msra.mxu3 %v3653_v33  ;;  %v3489_v33 = vor.u32 %v4096_v22, %v3486_v24  ;;  %v3345_v22 = vor.u32 %v4060_v17, %v3342_v18  ;;  %v4154_v24 = vld [vmem:[#allocation14] sm:$0xff] }
 0x142   :  { %2105 = vmatpush.bf16.msrb.mxu1 %v3273_v34  ;;  %2094 = vmatpush.bf16.msrb.mxu0 %v3033_v39  ;;  %v3533_v34 = vor.u32 %v4111_v28, %v3532_v27  ;;  %v4090_v39 = vld [vmem:[#allocation10 + $0x404] sm:$0xf]  ;;  %v4108_v27 = vld [vmem:[#allocation10 + $0x494] sm:$0xf]  ;;  %v3534_v28 = vld [vmem:[#allocation10 + $0x4a8] sm:$0xf0] }
 0x143   :  { %2068 = vmatpush.bf16.msra.mxu2 %v3413_v55  ;;  %v3465_v42 = vor.u32 %v4090_v39, %v3462_v46  ;;  %v3681_v55 = vor.u32 %v4144_v40, %v3678_v51  ;;  %v3537_v32 = vor.u32 %v4108_v27, %v3534_v28  ;;  %v4162_v40 = vld [vmem:[#allocation14 + $0x40] sm:$0xff] }
 0x144   :  { %v4174_v51 = vld [vmem:[#allocation14 + $0xa0] sm:$0xff] }
 0x145   :  { %2080 = vmatpush.bf16.msra.mxu3 %v3629_v44  ;;  %v4084_v44 = vld [vmem:[#allocation10 + $0x3d4] sm:$0xf] }
 0x146   :  { %2106 = vmatpush.bf16.msrb.mxu1 %v3249_v50  ;;  %2095 = vmatpush.bf16.msrb.mxu0 %v3009_v49  ;;  %v3438_v50 = vld [vmem:[#allocation10 + $0x3e8] sm:$0xf0] }
 0x147   :  { %2069 = vmatpush.bf16.msra.mxu2 %v3389_v58  ;;  %v3441_v49 = vor.u32 %v4084_v44, %v3438_v50  ;;  %v4157_v58 = vld [vmem:[#allocation14 + $0x18] sm:$0xff] }
 0x148   :  { %v4603_v50 = vld [vmem:[#allocation13] sm:$0x3f] }
 0x149   :  { %2081 = vmatpush.bf16.msra.mxu3 %v3605_v59  ;;  %v4169_v59 = vld [vmem:[#allocation14 + $0x78] sm:$0xff] }
 0x14a   :  { %2107 = vmatpush.bf16.msrb.mxu1 %v3225_v60  ;;  %2096 = vmatpush.bf16.msrb.mxu0 %v2985_v0  ;;  %v3417_v60 = vor.u32 %v4078_v53, %v3414_v54  ;;  %v2164_v53 = vperm.slane %v4603_v50, 0 }
 0x14b   :  { %2070 = vmatpush.bf16.msra.mxu2 %v3365_v7  ;;  %v3609_v7 = vor.u32 %v4126_v2, %v3606_v3 }
 0x14d   :  { %2082 = vmatpush.bf16.msra.mxu3 %v3581_v8  ;;  %v4587_v45 = vpop.f32.mrf.mxu0  ;;  %v4066_v8 = vld [vmem:[#allocation10 + $0x344] sm:$0xf] }
 0x14e   :  { %2108 = vmatpush.bf16.msrb.mxu1 %v3201_v9  ;;  %2097 = vmatpush.bf16.msrb.mxu0 %v2961_v13  ;;  %v3366_v9 = vld [vmem:[#allocation10 + $0x358] sm:$0xf0]  ;;  %v4155_v13 = vld [vmem:[#allocation14 + $0x8] sm:$0xff] }
 0x14f   :  { %2071 = vmatpush.bf16.msra.mxu2 %v3341_v19  ;;  %v3369_v12 = vor.u32 %v4066_v8, %v3366_v9  ;;  %v2165_v8 = vperm.slane %v4603_v50, 1 }
 0x151   :  { %2083 = vmatpush.bf16.msra.mxu3 %v3557_v21  ;;  %2098 = vmatmul.bf16.vlgmr.msrb.gmra.mxu0 %v4555_v23  ;;  %v4138_v23 = vld [vmem:[#allocation10 + $0x584] sm:$0xf]  ;;  %v3558_v21 = vld [vmem:[#allocation10 + $0x4d8] sm:$0xf0] }
 0x152   :  { %2582 = vmatpush.bf16.msra.mxu0 %v4161_v25  ;;  %2109 = vmatpush.bf16.msrb.mxu1 %v3177_v26  ;;  %v3657_v52 = vor.u32 %v4138_v23, %v3654_v47  ;;  %v4166_v25 = vld [vmem:[#allocation14 + $0x60] sm:$0xff] }
 0x153   :  { %2116 = vmatpush.bf16.msrb.mxu2 %v3513_v20  ;;  %v4114_v20 = vld [vmem:[#allocation10 + $0x4c4] sm:$0xf] }
 0x154   :  { %2072 = vmatmul.bf16.vlgmr.msra.gmra.mxu2 %v4567_v37  ;;  %v3561_v26 = vor.u32 %v4114_v20, %v3558_v21  ;;  %v4180_v21 = vld [vmem:[#allocation14 + $0xd0] sm:$0xff] }
 0x155   :  { %2084 = vmatpush.bf16.msra.mxu3 %v3533_v34  ;;  %v4591_v61 = vpop.f32.mrf.mxu1  ;;  %v1841_v0 = vpop.f32.mrf.mxu0  ;;  %v4164_v34 = vld [vmem:[#allocation14 + $0x50] sm:$0xff] }
 0x156   :  { %2583 = vmatpush.bf16.msra.mxu0 %v4160_v35  ;;  %2110 = vmatpush.bf16.msrb.mxu1 %v3153_v36  ;;  %v4176_v35 = vld [vmem:[#allocation14 + $0xb0] sm:$0xff]  ;;  %v4163_v36 = vld [vmem:[#allocation14 + $0x48] sm:$0xff] }
 0x157   :  { %2117 = vmatpush.bf16.msrb.mxu2 %v3489_v33  ;;  %v4184_v0 = vld [vmem:[#allocation14 + $0xf0] sm:$0xff] }
 0x158   :  { %2085 = vmatmul.bf16.vlgmr.msra.gmra.mxu3 %v4571_v1 }
 0x159   :  { %2129 = vmatpush.bf16.msrb.mxu3 %v3705_v38  ;;  %2111 = vmatmul.bf16.vlgmr.msrb.gmra.mxu1 %v4558_v41  ;;  %v3390_v41 = vld [vmem:[#allocation10 + $0x388] sm:$0xf0]  ;;  %v4175_v38 = vld [vmem:[#allocation14 + $0xa8] sm:$0xff] }
 0x15a   :  { %2584 = vmatpush.bf16.msra.mxu0 %v4159_v43  ;;  %2595 = vmatpush.bf16.msra.mxu1 %v4169_v59  ;;  %v3393_v4 = vor.u32 %v4072_v63, %v3390_v41  ;;  %v4173_v43 = vld [vmem:[#allocation14 + $0x98] sm:$0xff] }
 0x15b   :  { %2118 = vmatpush.bf16.msrb.mxu2 %v3465_v42 }
 0x15d   :  { %2130 = vmatpush.bf16.msrb.mxu3 %v3681_v55  ;;  %v1854_v15 = vpop.f32.mrf.mxu1  ;;  %v4593_v19 = vpop.f32.mrf.mxu0  ;;  %v1853_v55 = vadd.f32 %v4591_v61, %v4587_v45  ;;  %v4170_v61 = vld [vmem:[#allocation14 + $0x80] sm:$0xff] }
 0x15e   :  { %2585 = vmatpush.bf16.msra.mxu0 %v4158_v48  ;;  %2596 = vmatpush.bf16.msra.mxu1 %v4168_v6  ;;  %v4183_v6 = vld [vmem:[#allocation14 + $0xe8] sm:$0xff] }
 0x15f   :  { %2119 = vmatpush.bf16.msrb.mxu2 %v3441_v49  ;;  %v4172_v49 = vld [vmem:[#allocation14 + $0x90] sm:$0xff] }
 0x161   :  { %2131 = vmatpush.bf16.msrb.mxu3 %v3657_v52 }
 0x162   :  { %2586 = vmatpush.bf16.msra.mxu0 %v4157_v58  ;;  %2597 = vmatpush.bf16.msra.mxu1 %v4167_v14 }
 0x163   :  { %2120 = vmatpush.bf16.msrb.mxu2 %v3417_v60 }
 0x165   :  { %2132 = vmatpush.bf16.msrb.mxu3 %v3633_v62  ;;  %v1904_v31 = vpop.f32.mrf.mxu1  ;;  %v1893_v33 = vpop.f32.mrf.mxu0  ;;  %v4185_v62 = vld [vmem:[#allocation14 + $0xf8] sm:$0xff] }
 0x166   :  { %2587 = vmatpush.bf16.msra.mxu0 %v4156_v5  ;;  %2598 = vmatpush.bf16.msra.mxu1 %v4166_v25  ;;  %v1905_v2 = vadd.f32 %v1904_v31, %v4593_v19  ;;  %v4178_v33 = vld [vmem:[#allocation14 + $0xc0] sm:$0xff] }
 0x167   :  { %2121 = vmatpush.bf16.msrb.mxu2 %v3393_v4 }
 0x169   :  { %2133 = vmatpush.bf16.msrb.mxu3 %v3609_v7 }
 0x16a   :  { %2588 = vmatpush.bf16.msra.mxu0 %v4155_v13  ;;  %2599 = vmatpush.bf16.msra.mxu1 %v4165_v29  ;;  %v2166_v29 = vperm.slane %v4603_v50, 2 }
 0x16b   :  { %2122 = vmatpush.bf16.msrb.mxu2 %v3369_v12 }
 0x16d   :  { %2134 = vmatpush.bf16.msrb.mxu3 %v3585_v16  ;;  %v1906_v39 = vpop.f32.mrf.mxu1  ;;  %v4597_v46 = vpop.f32.mrf.mxu0  ;;  %v4181_v16 = vld [vmem:[#allocation14 + $0xd8] sm:$0xff] }
 0x16e   :  { %2589 = vmatpush.bf16.msra.mxu0 %v4154_v24  ;;  %2600 = vmatpush.bf16.msra.mxu1 %v4164_v34  ;;  %v4193_v34 = vld [vmem:[#allocation14 + $0x138] sm:$0xff] }
 0x16f   :  { %2123 = vmatpush.bf16.msrb.mxu2 %v3345_v22 }
 0x171   :  { %2135 = vmatpush.bf16.msrb.mxu3 %v3561_v26  ;;  %v4179_v26 = vld [vmem:[#allocation14 + $0xc8] sm:$0xff] }
 0x172   :  { %2124 = vmatmul.bf16.vlgmr.msrb.gmra.mxu2 %v4567_v37  ;;  %2601 = vmatpush.bf16.msra.mxu1 %v4163_v36  ;;  %v4599_v37 = vld [vmem:[#allocation11] sm:$0x3f] }
 0x173   :  { %2608 = vmatpush.bf16.msra.mxu2 %v4177_v30  ;;  %v1865_v42 = vpop.f32.mrf.mxu2  ;;  %v2144_v47 = vperm.slane %v4599_v37, 0  ;;  %v2145_v4 = vperm.slane %v4599_v37, 1  ;;  %v2146_v25 = vperm.slane %v4599_v37, 2  ;;  %2634 = vmatpush.bf16.msrb.mxu0 %v4193_v34 }
 0x174   :  { %v1866_v23 = vadd.f32 %v1865_v42, %v1853_v55 }
 0x175   :  { %2136 = vmatpush.bf16.msrb.mxu3 %v3537_v32 }
 0x176   :  { %2602 = vmatpush.bf16.msra.mxu1 %v4162_v40  ;;  %v4191_v40 = vld [vmem:[#allocation14 + $0x128] sm:$0xff] }
 0x177   :  { %2609 = vmatpush.bf16.msra.mxu2 %v4176_v35 }
 0x178   :  { %2137 = vmatmul.bf16.vlgmr.msrb.gmra.mxu3 %v4571_v1  ;;  %v1956_v44 = vpop.f32.mrf.mxu1  ;;  %v1945_v1 = vpop.f32.mrf.mxu0 }
 0x179   :  { %2621 = vmatpush.bf16.msra.mxu3 %v4185_v62  ;;  %v1957_v22 = vadd.f32 %v1956_v44, %v4597_v46 }
 0x17b   :  { %2610 = vmatpush.bf16.msra.mxu2 %v4175_v38  ;;  %v1878_v48 = vpop.f32.mrf.mxu3  ;;  %v1867_v54 = vpop.f32.mrf.mxu2  ;;  %v4192_v38 = vld [vmem:[#allocation14 + $0x130] sm:$0xff] }
 0x17c   :  { %v1879_v52 = vadd.f32 %v1878_v48, %v1866_v23  ;;  %2635 = vmatpush.bf16.msrb.mxu0 %v4192_v38  ;;  %v4188_v23 = vld [vmem:[#allocation14 + $0x110] sm:$0xff] }
 0x17d   :  { %2622 = vmatpush.bf16.msra.mxu3 %v4184_v0 }
 0x17e   :  { %v2156_v56 = vmul.f32 %v2144_v47, %v1879_v52 }
 0x17f   :  { %2611 = vmatpush.bf16.msra.mxu2 %v4174_v51  ;;  %v4190_v51 = vld [vmem:[#allocation14 + $0x120] sm:$0xff] }
 0x180   :  { %v2176_v58 = vadd.f32 %v2164_v53, %v2156_v56  ;;  %v1958_v59 = vpop.f32.mrf.mxu1  ;;  %2636 = vmatpush.bf16.msrb.mxu0 %v4191_v40  ;;  %v4187_v53 = vld [vmem:[#allocation14 + $0x108] sm:$0xff]  ;;  %v2167_v56 = vperm.slane %v4603_v50, 3 }
 0x181   :  { %2623 = vmatpush.bf16.msra.mxu3 %v4183_v6 }
 0x182   :  { %v2182_v45 = vmax.f32 %v2176_v58, 0.0 }
 0x183   :  { %2612 = vmatpush.bf16.msra.mxu2 %v4173_v43  ;;  %v1880_v60 = vpop.f32.mrf.mxu3  ;;  %v1917_v41 = vpop.f32.mrf.mxu2  ;;  %v4189_v43 = vld [vmem:[#allocation14 + $0x118] sm:$0xff] }
 0x184   :  { %v2188_v63 = vpack.c.bf16 %v2182_v45, %v2182_v45  ;;  %v1918_v3 = vadd.f32 %v1917_v41, %v1905_v2  ;;  %2637 = vmatpush.bf16.msrb.mxu0 %v4190_v51  ;;  %v4186_v45 = vld [vmem:[#allocation14 + $0x100] sm:$0xff]  ;;  %v4200_v41 = vld [vmem:[#allocation14 + $0x170] sm:$0xff]  ;;  %v4199_v2 = vld [vmem:[#allocation14 + $0x168] sm:$0xff] }
 0x185   :  { %2624 = vmatpush.bf16.msra.mxu3 %v4182_v10  ;;  %v4217_v51 = vld [vmem:[%s4633_s8] ss:$0 sm:$0xff] }
 0x186   :  { %2590 = vmatmul.bf16.vlgmr.msra.gmra.mxu0 %v2188_v63 }
 0x187   :  { %2613 = vmatpush.bf16.msra.mxu2 %v4172_v49  ;;  %v2147_v49 = vperm.slane %v4599_v37, 3 }
 0x188   :  { %2638 = vmatpush.bf16.msrb.mxu0 %v4189_v43 }
 0x189   :  { %2625 = vmatpush.bf16.msra.mxu3 %v4181_v16  ;;  %v2168_v16 = vperm.slane %v4603_v50, 4 }
 0x18b   :  { %2614 = vmatpush.bf16.msra.mxu2 %v4171_v57  ;;  %v1930_v5 = vpop.f32.mrf.mxu3  ;;  %v1919_v9 = vpop.f32.mrf.mxu2 }
 0x18c   :  { %v1931_v7 = vadd.f32 %v1930_v5, %v1918_v3  ;;  %2639 = vmatpush.bf16.msrb.mxu0 %v4188_v23  ;;  %v4198_v3 = vld [vmem:[#allocation14 + $0x160] sm:$0xff]  ;;  %v4197_v5 = vld [vmem:[#allocation14 + $0x158] sm:$0xff]  ;;  %v4196_v9 = vld [vmem:[#allocation14 + $0x150] sm:$0xff] }
 0x18d   :  { %2626 = vmatpush.bf16.msra.mxu3 %v4180_v21 }
 0x18e   :  { %v2157_v11 = vmul.f32 %v2145_v4, %v1931_v7 }
 0x18f   :  { %2615 = vmatpush.bf16.msra.mxu2 %v4170_v61  ;;  %v4201_v61 = vld [vmem:[#allocation14 + $0x178] sm:$0xff] }
 0x190   :  { %v1995_v12 = vpop.f32.mrf.mxu0  ;;  %v2177_v13 = vadd.f32 %v2165_v8, %v2157_v11  ;;  %2640 = vmatpush.bf16.msrb.mxu0 %v4187_v53  ;;  %2647 = vmatpush.bf16.msrb.mxu1 %v4201_v61 }
 0x191   :  { %2627 = vmatpush.bf16.msra.mxu3 %v4179_v26 }
 0x192   :  { %v2183_v14 = vmax.f32 %v2177_v13, 0.0 }
 0x193   :  { %v1932_v15 = vpop.f32.mrf.mxu3  ;;  %v1969_v19 = vpop.f32.mrf.mxu2 }
 0x194   :  { %v2189_v17 = vpack.c.bf16 %v2183_v14, %v2183_v14  ;;  %v1970_v24 = vadd.f32 %v1969_v19, %v1957_v22  ;;  %2641 = vmatpush.bf16.msrb.mxu0 %v4186_v45  ;;  %2648 = vmatpush.bf16.msrb.mxu1 %v4200_v41  ;;  %v4195_v14 = vld [vmem:[#allocation14 + $0x148] sm:$0xff] }
 0x195   :  { %2628 = vmatpush.bf16.msra.mxu3 %v4178_v33 }
 0x196   :  { %v2008_v18 = vpop.f32.mrf.mxu1  ;;  %2603 = vmatmul.bf16.vlgmr.msra.gmra.mxu1 %v2189_v17 }
 0x197   :  { %v2009_v47 = vadd.f32 %v2008_v18, %v1995_v12  ;;  %v2148_v12 = vperm.slane %v4599_v37, 4 }
 0x198   :  { %v1997_v20 = vpop.f32.mrf.mxu0  ;;  %2649 = vmatpush.bf16.msrb.mxu1 %v4199_v2 }
 0x199   :  { %v4194_v20 = vld [vmem:[#allocation14 + $0x140] sm:$0xff] }
 0x19b   :  { %v1982_v27 = vpop.f32.mrf.mxu3  ;;  %v1971_v31 = vpop.f32.mrf.mxu2 }
 0x19c   :  { %v1983_v28 = vadd.f32 %v1982_v27, %v1970_v24  ;;  %2650 = vmatpush.bf16.msrb.mxu1 %v4198_v3 }
 0x19e   :  { %v2010_v30 = vpop.f32.mrf.mxu1  ;;  %v2158_v32 = vmul.f32 %v2146_v25, %v1983_v28 }
 0x1a0   :  { %v2178_v35 = vadd.f32 %v2166_v29, %v2158_v32  ;;  %2651 = vmatpush.bf16.msrb.mxu1 %v4197_v5  ;;  %v2149_v29 = vperm.slane %v4599_v37, 5  ;;  %v2169_v32 = vperm.slane %v4603_v50, 5 }
 0x1a2   :  { %v2184_v36 = vmax.f32 %v2178_v35, 0.0 }
 0x1a3   :  { %v1984_v39 = vpop.f32.mrf.mxu3 }
 0x1a4   :  { %v2190_v46 = vpack.c.bf16 %v2184_v36, %v2184_v36  ;;  %2652 = vmatpush.bf16.msrb.mxu1 %v4196_v9 }
 0x1a6   :  { %2616 = vmatmul.bf16.vlgmr.msra.gmra.mxu2 %v2190_v46 }
 0x1a8   :  { %2653 = vmatpush.bf16.msrb.mxu1 %v4195_v14 }
 0x1ac   :  { %2654 = vmatpush.bf16.msrb.mxu1 %v4194_v20 }
 0x1ae   :  { %v2047_v42 = vpop.f32.mrf.mxu0 }
 0x1b6   :  { %v2060_v44 = vpop.f32.mrf.mxu1  ;;  %v2049_v1 = vpop.f32.mrf.mxu0 }
 0x1b7   :  { %v2021_v55 = vpop.f32.mrf.mxu2  ;;  %v2061_v10 = vadd.f32 %v2060_v44, %v2047_v42 }
 0x1b8   :  { %v2022_v48 = vadd.f32 %v2021_v55, %v2009_v47 }
 0x1bb   :  { %v2034_v52 = vpop.f32.mrf.mxu3 }
 0x1bc   :  { %v2035_v54 = vadd.f32 %v2034_v52, %v2022_v48 }
 0x1be   :  { %v2062_v58 = vpop.f32.mrf.mxu1  ;;  %v2159_v59 = vmul.f32 %v2147_v49, %v2035_v54 }
 0x1bf   :  { %v2023_v57 = vpop.f32.mrf.mxu2 }
 0x1c0   :  { %v2179_v60 = vadd.f32 %v2167_v56, %v2159_v59 }
 0x1c2   :  { %v2185_v62 = vmax.f32 %v2179_v60, 0.0 }
 0x1c3   :  { %v2036_v63 = vpop.f32.mrf.mxu3 }
 0x1c4   :  { %v2191_v0 = vpack.c.bf16 %v2185_v62, %v2185_v62 }
 0x1c6   :  { %2629 = vmatmul.bf16.vlgmr.msra.gmra.mxu3 %v2191_v0 }
 0x1ce   :  { %v2099_v4 = vpop.f32.mrf.mxu0 }
 0x1d6   :  { %v2112_v7 = vpop.f32.mrf.mxu1  ;;  %v2101_v8 = vpop.f32.mrf.mxu0 }
 0x1d7   :  { %v2073_v6 = vpop.f32.mrf.mxu2  ;;  %v2113_v27 = vadd.f32 %v2112_v7, %v2099_v4 }
 0x1d8   :  { %v2074_v11 = vadd.f32 %v2073_v6, %v2061_v10 }
 0x1db   :  { %v2086_v13 = vpop.f32.mrf.mxu3 }
 0x1dc   :  { %v2087_v15 = vadd.f32 %v2086_v13, %v2074_v11 }
 0x1de   :  { %v2160_v17 = vmul.f32 %v2148_v12, %v2087_v15  ;;  %v2114_v19 = vpop.f32.mrf.mxu1 }
 0x1df   :  { %v2075_v18 = vpop.f32.mrf.mxu2 }
 0x1e0   :  { %v2180_v21 = vadd.f32 %v2168_v16, %v2160_v17 }
 0x1e2   :  { %v2186_v22 = vmax.f32 %v2180_v21, 0.0 }
 0x1e3   :  { %v2088_v24 = vpop.f32.mrf.mxu3 }
 0x1e4   :  { %v2192_v25 = vpack.c.bf16 %v2186_v22, %v2186_v22 }
 0x1e6   :  { %2642 = vmatmul.bf16.vlgmr.msrb.gmra.mxu0 %v2192_v25 }
 0x1f5   :  { %v2125_v26 = vpop.f32.mrf.mxu2 }
 0x1f6   :  { %v2126_v28 = vadd.f32 %v2125_v26, %v2113_v27 }
 0x1fb   :  { %v2138_v30 = vpop.f32.mrf.mxu3 }
 0x1fc   :  { %v2139_v31 = vadd.f32 %v2138_v30, %v2126_v28 }
 0x1fd   :  { %v2127_v34 = vpop.f32.mrf.mxu2 }
 0x1fe   :  { %v2161_v33 = vmul.f32 %v2149_v29, %v2139_v31 }
 0x200   :  { %v2181_v35 = vadd.f32 %v2169_v32, %v2161_v33 }
 0x202   :  { %v2187_v36 = vmax.f32 %v2181_v35, 0.0 }
 0x203   :  { %v2140_v38 = vpop.f32.mrf.mxu3  ;;  %v2591_v46 = vpop.f32.mrf.mxu0 }
 0x204   :  { %v2193_v39 = vpack.c.bf16 %v2187_v36, %v2187_v36  ;;  %v2592_v42 = vadd.f32 %v4217_v51, %v2591_v46 }
 0x206   :  { %2655 = vmatmul.bf16.vlgmr.msrb.gmra.mxu1 %v2193_v39 }
 0x20b   :  { %v2593_v40 = vpop.f32.mrf.mxu0 }
 0x213   :  { %v2604_v43 = vpop.f32.mrf.mxu1 }
 0x214   :  { %v2605_v37 = vadd.f32 %v2604_v43, %v2592_v42 }
 0x21b   :  { %v2606_v55 = vpop.f32.mrf.mxu1 }
 0x229   :  { %v2617_v44 = vpop.f32.mrf.mxu2 }
 0x22a   :  { %v2618_v1 = vadd.f32 %v2617_v44, %v2605_v37 }
 0x231   :  { %v2619_v50 = vpop.f32.mrf.mxu2 }
 0x249   :  { %v2630_v23 = vpop.f32.mrf.mxu3 }
 0x24a   :  { %v2631_v52 = vadd.f32 %v2630_v23, %v2618_v1 }
 0x251   :  { %v2632_v47 = vpop.f32.mrf.mxu3 }
 0x263   :  { %v2643_v48 = vpop.f32.mrf.mxu0 }
 0x264   :  { %v2644_v53 = vadd.f32 %v2643_v48, %v2631_v52 }
 0x26b   :  { %v2645_v49 = vpop.f32.mrf.mxu0 }
 0x283   :  { %v2656_v54 = vpop.f32.mrf.mxu1 }
 0x284   :  { %v2657_v56 = vadd.f32 %v2656_v54, %v2644_v53 }
 0x286   :  { %2660 = vst [vmem:[#allocation16] sm:$0xff] %v2657_v56 }
 0x287   :  { %2671 = dma.vmem_to_hbm [thread:$0]  %s2667_s3, 128, %s2669_s30, [#allocation4]  }
 0x28b   :  { %v2658_v57 = vpop.f32.mrf.mxu1 }
 0x28c   :  { %4444 = dma.done.wait [#allocation4], 128  }
 0x28d   :  { %4445 = vsyncadd [#allocation4], 4294967168 }
 0x28e   :  { %2676 = vsyncpa [#allocation3], 1 }
 0x28f   :  { %2677 = vsyncpa [#allocation6], 1 }
 0x290   :  { %2678 = vsyncpa [#allocation9], 1 }
 0x291   :  { %2679 = vsyncpa [#allocation12], 1 }
 0x292   :  { %2680 = vsyncpa [#allocation15], 1 }
 0x293   :  { %2681 = vsyncpa [#allocation4], 1 }

</bundles_post_ra>
